<compile_context>
chip_gen: v7x
topology: tpu7x:2x2x1
jax: 0.10.0
libtpu: 0.0.40
codegen_flags: <defaults>
</compile_context>

<pallas_src>
import functools
import math

import jax
import jax.numpy as jnp
from jax import lax
from jax.experimental import pallas as pl
from jax.experimental.pallas import tpu as pltpu
import numpy as np


# ----------------------------------------------------------------------------
# Fused Pallas kernel: conv x3 (+ReLU) -> LSTM (last hidden) -> fc1/ReLU/fc2
# ----------------------------------------------------------------------------

def _fused_forward_kernel(seq_ref, static_ref, conv_ref, lstm_ref, head_ref, outw_ref,
                          out_ref, *, layout, matmul_dtype):
    L = layout
    B, T, H, S = L["B"], L["T"], L["H"], L["S"]

    def mm(a, b):
        # MXU matmul; optionally cast operands to bf16 (f32 accumulate) on v6e/v7x.
        if matmul_dtype != jnp.float32:
            a = a.astype(matmul_dtype)
            b = b.astype(matmul_dtype)
        return jnp.dot(a, b, preferred_element_type=jnp.float32)

    # -- 3x dilated Conv1d(kernel=3, padding=d) + ReLU, time-major fold (T*B, C) -------
    # Each layer: zero-pad d time steps on both ends (sublane concat), then sum of three
    # shifted-tap matmuls. Tap k at output row (t, b) reads input time t + (k-1)*d.
    x = seq_ref[...]                                             # (T*B, Cin)
    for (tap_offs, bias_off, cin, cout, d) in L["convs"]:
        pad = jnp.zeros((d * B, cin), jnp.float32)
        xp = jnp.concatenate([pad, x, pad], axis=0)              # ((T+2d)*B, cin)
        acc = conv_ref[bias_off:bias_off + 1, :]                 # (1, cout) bias, broadcasts
        for k in range(3):
            tap = xp[k * d * B:k * d * B + T * B, :]             # (T*B, cin), static slice
            w_k = conv_ref[tap_offs[k]:tap_offs[k] + cin, :]     # (cin, cout), 8-aligned
            acc = acc + mm(tap, w_k)
        x = jnp.maximum(acc, 0.0)                                # (T*B, cout)
    C = x.shape[-1]

    # -- LSTM: input projection + fused bias hoisted out of the recurrence -------------
    # Gate columns are pre-reordered to [i, f, o, g] so only 3H lanes need sigmoid.
    wih = lstm_ref[L["wih"]:L["wih"] + C, :]                     # (C, 4H)
    whh = lstm_ref[L["whh"]:L["whh"] + H, :]                     # (H, 4H), read once
    bl = lstm_ref[L["blstm"]:L["blstm"] + 1, :]                  # (1, 4H)
    gx = mm(x, wih) + bl                                         # (T*B, 4H), time-major

    h = jnp.zeros((B, H), jnp.float32)
    c = jnp.zeros((B, H), jnp.float32)
    for t in range(T):                                           # static -> fully unrolled
        gates = gx[t * B:(t + 1) * B, :] + mm(h, whh)            # (B, 4H)
        sig = jax.nn.sigmoid(gates[:, :3 * H])                   # [i | f | o] only
        i = sig[:, 0 * H:1 * H]
        f = sig[:, 1 * H:2 * H]
        o = sig[:, 2 * H:3 * H]
        g = jnp.tanh(gates[:, 3 * H:])
        c = f * c + i * g
        h = o * jnp.tanh(c)

    # -- head: fc1(concat(h, static)) == h @ W1h + static @ W1s + b1, ReLU, fc2 --------
    H1 = L["H1"]
    w1h = head_ref[L["w1h"]:L["w1h"] + H, :]                     # (H, H1)
    w1s = head_ref[L["w1s"]:L["w1s"] + S, :]                     # (S, H1)
    b1 = head_ref[L["b1"]:L["b1"] + 1, :]                        # (1, H1)
    hid = jnp.maximum(mm(h, w1h) + mm(static_ref[...], w1s) + b1, 0.0)
    # dropout is identity at inference time
    w2 = outw_ref[L["w2"]:L["w2"] + H1, :]                       # (H1, NC)
    b2 = outw_ref[L["b2"]:L["b2"] + 1, :]                        # (1, NC)
    out_ref[...] = mm(hid, w2) + b2


# ----------------------------------------------------------------------------
# One-time weight re-layout / gate reorder / operand packing + wrapper
# ----------------------------------------------------------------------------

def _round_up(x, m=8):
    return -(-x // m) * m


def _pack_rows(blocks):
    """Stack same-width 2D blocks; each block starts on an 8-aligned (tile-aligned) row."""
    width = blocks[0].shape[1]
    parts, offsets, off = [], [], 0
    for blk in blocks:
        pad = _round_up(off) - off
        if pad:
            parts.append(jnp.zeros((pad, width), jnp.float32))
            off += pad
        offsets.append(off)
        parts.append(blk.astype(jnp.float32))
        off += blk.shape[0]
    return jnp.concatenate(parts, axis=0), offsets


def prepare_params(params):
    """Re-layout PyTorch-shaped weights into 4 packed kernel buffers ONCE (off hot path)."""
    H = params["w_hh"].shape[1]

    # conv pack (width = conv_channels): per layer 3 tap matrices (Cin, Cout) + bias row.
    conv_blocks, conv_meta = [], []
    for (w, b, d) in params["convs"]:
        Cout, Cin, K = w.shape
        assert K == 3, "kernel is specialized to kernel_size=3"
        conv_meta.append((Cin, Cout, int(d)))
        for k in range(K):
            conv_blocks.append(jnp.transpose(w[:, :, k]))        # (Cin, Cout) = W_k
        conv_blocks.append(b.reshape(1, Cout))
    conv_pack, conv_offs = _pack_rows(conv_blocks)
    conv_layout = []
    for li, (Cin, Cout, d) in enumerate(conv_meta):
        o = conv_offs[4 * li:4 * li + 4]
        conv_layout.append((tuple(o[:3]), o[3], Cin, Cout, d))

    # LSTM pack (width = 4H): gate columns reordered [i, f, g, o] -> [i, f, o, g].
    def reorder(m):
        i, f, g, o = jnp.split(m, 4, axis=0)
        return jnp.concatenate([i, f, o, g], axis=0)

    wih = jnp.transpose(reorder(params["w_ih"]))                 # (C, 4H)
    whh = jnp.transpose(reorder(params["w_hh"]))                 # (H, 4H)
    bl = reorder(params["b_ih"] + params["b_hh"]).reshape(1, 4 * H)
    lstm_pack, (o_wih, o_whh, o_bl) = _pack_rows([wih, whh, bl])

    # head pack (width = H1): fc1 split into h-part / static-part + b1.
    fc1_w = params["fc1_w"]                                      # (H1, H + S)
    H1 = fc1_w.shape[0]
    S = fc1_w.shape[1] - H
    w1h = jnp.transpose(fc1_w[:, :H])                            # (H, H1)
    if S > 0:
        w1s = jnp.transpose(fc1_w[:, H:])                        # (S, H1)
    else:
        # static=None: a zero static feature + zero W1s keeps one fused fc1 path and is
        # numerically identical to the PyTorch static=None branch.
        w1s = jnp.zeros((1, H1), jnp.float32)
    b1 = params["fc1_b"].reshape(1, H1)
    head_pack, (o_w1h, o_w1s, o_b1) = _pack_rows([w1h, w1s, b1])

    # output pack (width = num_classes)
    w2 = jnp.transpose(params["fc2_w"])                          # (H1, NC)
    b2 = params["fc2_b"].reshape(1, -1)
    out_pack, (o_w2, o_b2) = _pack_rows([w2, b2])

    layout = {
        "H": H, "H1": H1, "S": max(S, 1),
        "convs": conv_layout,
        "wih": o_wih, "whh": o_whh, "blstm": o_bl,
        "w1h": o_w1h, "w1s": o_w1s, "b1": o_b1,
        "w2": o_w2, "b2": o_b2,
    }
    return {
        "conv_pack": conv_pack, "lstm_pack": lstm_pack,
        "head_pack": head_pack, "out_pack": out_pack,
        "layout": layout, "num_classes": params["fc2_w"].shape[0],
    }


def conv_seq_classifier_pallas(prep, seq, static=None, matmul_dtype=jnp.float32):
    B, T, Cin = seq.shape
    L = dict(prep["layout"])
    L["B"], L["T"] = int(B), int(T)
    assert len(L["convs"]) == 3, "fused kernel is specialized to 3 conv layers"
    if static is None:
        static = jnp.zeros((B, L["S"]), jnp.float32)

    # Time-major fold (row = t*B + b) once, outside the kernel: tap shifts are then
    # whole-row sublane shifts and per-step gate reads are contiguous static slices.
    seq_tm = jnp.swapaxes(seq, 0, 1).reshape(T * B, Cin)

    kernel = functools.partial(_fused_forward_kernel, layout=L, matmul_dtype=matmul_dtype)
    vmem = pl.BlockSpec(memory_space=pltpu.MemorySpace.VMEM)
    # Single fused, grid-less pallas_call: the whole problem (<0.2 MiB) is VMEM-resident.
    # TODO(synk): at larger B, add grid=(B//B_tile,) with dimension_semantics=("parallel",)
    #             and constant index_maps for the packed weights (v7x second TensorCore).
    return pl.pallas_call(
        kernel,
        out_shape=jax.ShapeDtypeStruct((B, prep["num_classes"]), jnp.float32),
        in_specs=[vmem] * 6,
        out_specs=vmem,
    )(seq_tm, static.astype(jnp.float32),
      prep["conv_pack"], prep["lstm_pack"], prep["head_pack"], prep["out_pack"])


# ----------------------------------------------------------------------------
# Pure-JAX reference mirroring the PyTorch forward
# ----------------------------------------------------------------------------

def conv_seq_classifier_ref(params, seq, static=None):
    x = jnp.swapaxes(seq, 1, 2)                                  # [B, C, T] (NCW)
    for (w, b, d) in params["convs"]:
        x = lax.conv_general_dilated(
            x, w, window_strides=(1,), padding=[(d, d)],
            rhs_dilation=(d,), dimension_numbers=("NCH", "OIH", "NCH"))
        x = jax.nn.relu(x + b[None, :, None])
    x = jnp.swapaxes(x, 1, 2)                                    # [B, T, C]

    B, T, C = x.shape
    H = params["w_hh"].shape[1]

    def step(carry, x_t):
        h, c = carry
        gates = (x_t @ params["w_ih"].T + params["b_ih"]
                 + h @ params["w_hh"].T + params["b_hh"])
        i, f, g, o = jnp.split(gates, 4, axis=-1)
        i, f, o = jax.nn.sigmoid(i), jax.nn.sigmoid(f), jax.nn.sigmoid(o)
        g = jnp.tanh(g)
        c = f * c + i * g
        h = o * jnp.tanh(c)
        return (h, c), None

    (h, _), _ = lax.scan(step, (jnp.zeros((B, H)), jnp.zeros((B, H))),
                         jnp.swapaxes(x, 0, 1))
    if static is not None:
        h = jnp.concatenate([h, static], axis=1)
    h = jax.nn.relu(h @ params["fc1_w"].T + params["fc1_b"])
    return h @ params["fc2_w"].T + params["fc2_b"]


def init_params(key, input_size, num_classes, static_size,
                conv_channels, conv_dilations, rnn_hidden):
    """Deterministic PyTorch-shaped parameters (uniform(-1/sqrt(fan_in), ...))."""
    def uni(k, shape, fan_in):
        bound = 1.0 / math.sqrt(fan_in)
        return jax.random.uniform(k, shape, jnp.float32, -bound, bound)

    keys = iter(jax.random.split(key, 32))
    params = {"convs": []}
    in_ch = input_size
    for d in conv_dilations:
        fan_in = in_ch * 3
        w = uni(next(keys), (conv_channels, in_ch, 3), fan_in)   # PyTorch [O, I, K]
        b = uni(next(keys), (conv_channels,), fan_in)
        params["convs"].append((w, b, d))
        in_ch = conv_channels

    H = rnn_hidden
    params["w_ih"] = uni(next(keys), (4 * H, conv_channels), H)
    params["w_hh"] = uni(next(keys), (4 * H, H), H)
    params["b_ih"] = uni(next(keys), (4 * H,), H)
    params["b_hh"] = uni(next(keys), (4 * H,), H)

    fc1_in = H + static_size
    params["fc1_w"] = uni(next(keys), (H, fc1_in), fc1_in)
    params["fc1_b"] = uni(next(keys), (H,), fc1_in)
    params["fc2_w"] = uni(next(keys), (num_classes, H), H)
    params["fc2_b"] = uni(next(keys), (num_classes,), H)
    return params


if __name__ == "__main__":
    # Small, shape-consistent config matching the module defaults.
    B, T = 2, 16
    input_size = 8
    num_classes = 5
    static_size = 4
    conv_channels = 32
    conv_dilations = (1, 2, 4)
    rnn_hidden = 64

    root = jax.random.PRNGKey(0)
    k_par, k_seq, k_sta = jax.random.split(root, 3)
    params = init_params(k_par, input_size, num_classes, static_size,
                         conv_channels, conv_dilations, rnn_hidden)
    seq = jax.random.normal(k_seq, (B, T, input_size), jnp.float32)
    static = jax.random.normal(k_sta, (B, static_size), jnp.float32)

    prep = prepare_params(params)                                # one-time re-layout + packing

    out = conv_seq_classifier_pallas(prep, seq, static)          # f32 MXU operands (default)
    out = jax.block_until_ready(out)

    ref = jax.block_until_ready(conv_seq_classifier_ref(params, seq, static))
    np.testing.assert_allclose(np.asarray(out), np.asarray(ref),
                               rtol=1e-4, atol=1e-4)
    print("KERNEL_OK")
</pallas_src>

<mosaic_0001>
module attributes {stable_mosaic.version = 11 : i64} {
  func.func @_fused_forward_kernel(%arg0: memref<32x8xf32, #tpu.memory_space<vmem>>, %arg1: memref<2x4xf32, #tpu.memory_space<vmem>>, %arg2: memref<233x32xf32, #tpu.memory_space<vmem>>, %arg3: memref<97x256xf32, #tpu.memory_space<vmem>>, %arg4: memref<73x64xf32, #tpu.memory_space<vmem>>, %arg5: memref<65x5xf32, #tpu.memory_space<vmem>>, %arg6: memref<2x5xf32, #tpu.memory_space<vmem>>) attributes {dimension_semantics = [], scalar_prefetch = 0 : i64, scratch_operands = 0 : i64, tpu.core_type = #tpu.core_type<tc>} {
    %c0 = arith.constant 0 : index
    %c0_0 = arith.constant 0 : index
    %0 = vector.load %arg0[%c0, %c0_0] : memref<32x8xf32, #tpu.memory_space<vmem>>, vector<32x8xf32>
    %cst = arith.constant 0.000000e+00 : f32
    %1 = vector.broadcast %cst : f32 to vector<2x8xf32>
    %2 = tpu.concatenate %1, %0, %1 in 0 : vector<2x8xf32>, vector<32x8xf32>, vector<2x8xf32> -> vector<36x8xf32>
    %c24 = arith.constant 24 : index
    %c0_1 = arith.constant 0 : index
    %3 = vector.load %arg2[%c24, %c0_1] : memref<233x32xf32, #tpu.memory_space<vmem>>, vector<1x32xf32>
    %4 = vector.extract_strided_slice %2 {offsets = [0, 0], sizes = [32, 8], strides = [1, 1]} : vector<36x8xf32> to vector<32x8xf32>
    %c0_2 = arith.constant 0 : index
    %c0_3 = arith.constant 0 : index
    %5 = vector.load %arg2[%c0_2, %c0_3] : memref<233x32xf32, #tpu.memory_space<vmem>>, vector<8x32xf32>
    %cst_4 = arith.constant dense<0.000000e+00> : vector<32x32xf32>
    %6 = tpu.matmul %4, %5, %cst_4 {dimension_numbers = #tpu.dot_dimension_numbers<[1], [0], [0], [1], [0, 0, 1, 1], [], []>} : vector<32x8xf32>, vector<8x32xf32>, vector<32x32xf32> -> vector<32x32xf32>
    %7 = vector.broadcast %3 : vector<1x32xf32> to vector<32x32xf32>
    %8 = arith.addf %7, %6 : vector<32x32xf32>
    %9 = vector.extract_strided_slice %2 {offsets = [2, 0], sizes = [32, 8], strides = [1, 1]} : vector<36x8xf32> to vector<32x8xf32>
    %c8 = arith.constant 8 : index
    %c0_5 = arith.constant 0 : index
    %10 = vector.load %arg2[%c8, %c0_5] : memref<233x32xf32, #tpu.memory_space<vmem>>, vector<8x32xf32>
    %cst_6 = arith.constant dense<0.000000e+00> : vector<32x32xf32>
    %11 = tpu.matmul %9, %10, %cst_6 {dimension_numbers = #tpu.dot_dimension_numbers<[1], [0], [0], [1], [0, 0, 1, 1], [], []>} : vector<32x8xf32>, vector<8x32xf32>, vector<32x32xf32> -> vector<32x32xf32>
    %12 = arith.addf %8, %11 : vector<32x32xf32>
    %13 = vector.extract_strided_slice %2 {offsets = [4, 0], sizes = [32, 8], strides = [1, 1]} : vector<36x8xf32> to vector<32x8xf32>
    %c16 = arith.constant 16 : index
    %c0_7 = arith.constant 0 : index
    %14 = vector.load %arg2[%c16, %c0_7] : memref<233x32xf32, #tpu.memory_space<vmem>>, vector<8x32xf32>
    %cst_8 = arith.constant dense<0.000000e+00> : vector<32x32xf32>
    %15 = tpu.matmul %13, %14, %cst_8 {dimension_numbers = #tpu.dot_dimension_numbers<[1], [0], [0], [1], [0, 0, 1, 1], [], []>} : vector<32x8xf32>, vector<8x32xf32>, vector<32x32xf32> -> vector<32x32xf32>
    %16 = arith.addf %12, %15 : vector<32x32xf32>
    %cst_9 = arith.constant 0.000000e+00 : f32
    %17 = vector.broadcast %cst_9 : f32 to vector<32x32xf32>
    %18 = arith.maximumf %16, %17 : vector<32x32xf32>
    %cst_10 = arith.constant 0.000000e+00 : f32
    %19 = vector.broadcast %cst_10 : f32 to vector<4x32xf32>
    %20 = tpu.concatenate %19, %18, %19 in 0 : vector<4x32xf32>, vector<32x32xf32>, vector<4x32xf32> -> vector<40x32xf32>
    %c128 = arith.constant 128 : index
    %c0_11 = arith.constant 0 : index
    %21 = vector.load %arg2[%c128, %c0_11] : memref<233x32xf32, #tpu.memory_space<vmem>>, vector<1x32xf32>
    %22 = vector.extract_strided_slice %20 {offsets = [0, 0], sizes = [32, 32], strides = [1, 1]} : vector<40x32xf32> to vector<32x32xf32>
    %c32 = arith.constant 32 : index
    %c0_12 = arith.constant 0 : index
    %23 = vector.load %arg2[%c32, %c0_12] : memref<233x32xf32, #tpu.memory_space<vmem>>, vector<32x32xf32>
    %cst_13 = arith.constant dense<0.000000e+00> : vector<32x32xf32>
    %24 = tpu.matmul %22, %23, %cst_13 {dimension_numbers = #tpu.dot_dimension_numbers<[1], [0], [0], [1], [0, 0, 1, 1], [], []>} : vector<32x32xf32>, vector<32x32xf32>, vector<32x32xf32> -> vector<32x32xf32>
    %25 = vector.broadcast %21 : vector<1x32xf32> to vector<32x32xf32>
    %26 = arith.addf %25, %24 : vector<32x32xf32>
    %27 = vector.extract_strided_slice %20 {offsets = [4, 0], sizes = [32, 32], strides = [1, 1]} : vector<40x32xf32> to vector<32x32xf32>
    %c64 = arith.constant 64 : index
    %c0_14 = arith.constant 0 : index
    %28 = vector.load %arg2[%c64, %c0_14] : memref<233x32xf32, #tpu.memory_space<vmem>>, vector<32x32xf32>
    %cst_15 = arith.constant dense<0.000000e+00> : vector<32x32xf32>
    %29 = tpu.matmul %27, %28, %cst_15 {dimension_numbers = #tpu.dot_dimension_numbers<[1], [0], [0], [1], [0, 0, 1, 1], [], []>} : vector<32x32xf32>, vector<32x32xf32>, vector<32x32xf32> -> vector<32x32xf32>
    %30 = arith.addf %26, %29 : vector<32x32xf32>
    %31 = vector.extract_strided_slice %20 {offsets = [8, 0], sizes = [32, 32], strides = [1, 1]} : vector<40x32xf32> to vector<32x32xf32>
    %c96 = arith.constant 96 : index
    %c0_16 = arith.constant 0 : index
    %32 = vector.load %arg2[%c96, %c0_16] : memref<233x32xf32, #tpu.memory_space<vmem>>, vector<32x32xf32>
    %cst_17 = arith.constant dense<0.000000e+00> : vector<32x32xf32>
    %33 = tpu.matmul %31, %32, %cst_17 {dimension_numbers = #tpu.dot_dimension_numbers<[1], [0], [0], [1], [0, 0, 1, 1], [], []>} : vector<32x32xf32>, vector<32x32xf32>, vector<32x32xf32> -> vector<32x32xf32>
    %34 = arith.addf %30, %33 : vector<32x32xf32>
    %cst_18 = arith.constant 0.000000e+00 : f32
    %35 = vector.broadcast %cst_18 : f32 to vector<32x32xf32>
    %36 = arith.maximumf %34, %35 : vector<32x32xf32>
    %cst_19 = arith.constant 0.000000e+00 : f32
    %37 = vector.broadcast %cst_19 : f32 to vector<8x32xf32>
    %38 = tpu.concatenate %37, %36, %37 in 0 : vector<8x32xf32>, vector<32x32xf32>, vector<8x32xf32> -> vector<48x32xf32>
    %c232 = arith.constant 232 : index
    %c0_20 = arith.constant 0 : index
    %39 = vector.load %arg2[%c232, %c0_20] : memref<233x32xf32, #tpu.memory_space<vmem>>, vector<1x32xf32>
    %40 = vector.extract_strided_slice %38 {offsets = [0, 0], sizes = [32, 32], strides = [1, 1]} : vector<48x32xf32> to vector<32x32xf32>
    %c136 = arith.constant 136 : index
    %c0_21 = arith.constant 0 : index
    %41 = vector.load %arg2[%c136, %c0_21] : memref<233x32xf32, #tpu.memory_space<vmem>>, vector<32x32xf32>
    %cst_22 = arith.constant dense<0.000000e+00> : vector<32x32xf32>
    %42 = tpu.matmul %40, %41, %cst_22 {dimension_numbers = #tpu.dot_dimension_numbers<[1], [0], [0], [1], [0, 0, 1, 1], [], []>} : vector<32x32xf32>, vector<32x32xf32>, vector<32x32xf32> -> vector<32x32xf32>
    %43 = vector.broadcast %39 : vector<1x32xf32> to vector<32x32xf32>
    %44 = arith.addf %43, %42 : vector<32x32xf32>
    %45 = vector.extract_strided_slice %38 {offsets = [8, 0], sizes = [32, 32], strides = [1, 1]} : vector<48x32xf32> to vector<32x32xf32>
    %c168 = arith.constant 168 : index
    %c0_23 = arith.constant 0 : index
    %46 = vector.load %arg2[%c168, %c0_23] : memref<233x32xf32, #tpu.memory_space<vmem>>, vector<32x32xf32>
    %cst_24 = arith.constant dense<0.000000e+00> : vector<32x32xf32>
    %47 = tpu.matmul %45, %46, %cst_24 {dimension_numbers = #tpu.dot_dimension_numbers<[1], [0], [0], [1], [0, 0, 1, 1], [], []>} : vector<32x32xf32>, vector<32x32xf32>, vector<32x32xf32> -> vector<32x32xf32>
    %48 = arith.addf %44, %47 : vector<32x32xf32>
    %49 = vector.extract_strided_slice %38 {offsets = [16, 0], sizes = [32, 32], strides = [1, 1]} : vector<48x32xf32> to vector<32x32xf32>
    %c200 = arith.constant 200 : index
    %c0_25 = arith.constant 0 : index
    %50 = vector.load %arg2[%c200, %c0_25] : memref<233x32xf32, #tpu.memory_space<vmem>>, vector<32x32xf32>
    %cst_26 = arith.constant dense<0.000000e+00> : vector<32x32xf32>
    %51 = tpu.matmul %49, %50, %cst_26 {dimension_numbers = #tpu.dot_dimension_numbers<[1], [0], [0], [1], [0, 0, 1, 1], [], []>} : vector<32x32xf32>, vector<32x32xf32>, vector<32x32xf32> -> vector<32x32xf32>
    %52 = arith.addf %48, %51 : vector<32x32xf32>
    %cst_27 = arith.constant 0.000000e+00 : f32
    %53 = vector.broadcast %cst_27 : f32 to vector<32x32xf32>
    %54 = arith.maximumf %52, %53 : vector<32x32xf32>
    %c0_28 = arith.constant 0 : index
    %c0_29 = arith.constant 0 : index
    %55 = vector.load %arg3[%c0_28, %c0_29] : memref<97x256xf32, #tpu.memory_space<vmem>>, vector<32x256xf32>
    %c32_30 = arith.constant 32 : index
    %c0_31 = arith.constant 0 : index
    %56 = vector.load %arg3[%c32_30, %c0_31] : memref<97x256xf32, #tpu.memory_space<vmem>>, vector<64x256xf32>
    %c96_32 = arith.constant 96 : index
    %c0_33 = arith.constant 0 : index
    %57 = vector.load %arg3[%c96_32, %c0_33] : memref<97x256xf32, #tpu.memory_space<vmem>>, vector<1x256xf32>
    %cst_34 = arith.constant dense<0.000000e+00> : vector<32x256xf32>
    %58 = tpu.matmul %54, %55, %cst_34 {dimension_numbers = #tpu.dot_dimension_numbers<[1], [0], [0], [1], [0, 0, 1, 1], [], []>} : vector<32x32xf32>, vector<32x256xf32>, vector<32x256xf32> -> vector<32x256xf32>
    %59 = vector.broadcast %57 : vector<1x256xf32> to vector<32x256xf32>
    %60 = arith.addf %58, %59 : vector<32x256xf32>
    %cst_35 = arith.constant 0.000000e+00 : f32
    %61 = vector.broadcast %cst_35 : f32 to vector<2x64xf32>
    %cst_36 = arith.constant 0.000000e+00 : f32
    %62 = vector.broadcast %cst_36 : f32 to vector<2x64xf32>
    %63 = vector.extract_strided_slice %60 {offsets = [0, 0], sizes = [2, 256], strides = [1, 1]} : vector<32x256xf32> to vector<2x256xf32>
    %cst_37 = arith.constant dense<0.000000e+00> : vector<2x256xf32>
    %64 = tpu.matmul %61, %56, %cst_37 {dimension_numbers = #tpu.dot_dimension_numbers<[1], [0], [0], [1], [0, 0, 1, 1], [], []>} : vector<2x64xf32>, vector<64x256xf32>, vector<2x256xf32> -> vector<2x256xf32>
    %65 = arith.addf %63, %64 : vector<2x256xf32>
    %66 = vector.extract_strided_slice %65 {offsets = [0, 0], sizes = [2, 192], strides = [1, 1]} : vector<2x256xf32> to vector<2x192xf32>
    %67 = arith.negf %66 : vector<2x192xf32>
    %68 = math.exp %67 : vector<2x192xf32>
    %cst_38 = arith.constant 1.000000e+00 : f32
    %69 = vector.broadcast %cst_38 : f32 to vector<2x192xf32>
    %70 = arith.addf %69, %68 : vector<2x192xf32>
    %71 = arith.divf %69, %70 : vector<2x192xf32>
    %72 = vector.extract_strided_slice %71 {offsets = [0, 0], sizes = [2, 64], strides = [1, 1]} : vector<2x192xf32> to vector<2x64xf32>
    %73 = vector.extract_strided_slice %71 {offsets = [0, 64], sizes = [2, 64], strides = [1, 1]} : vector<2x192xf32> to vector<2x64xf32>
    %74 = vector.extract_strided_slice %71 {offsets = [0, 128], sizes = [2, 64], strides = [1, 1]} : vector<2x192xf32> to vector<2x64xf32>
    %75 = vector.extract_strided_slice %65 {offsets = [0, 192], sizes = [2, 64], strides = [1, 1]} : vector<2x256xf32> to vector<2x64xf32>
    %76 = math.tanh %75 : vector<2x64xf32>
    %77 = arith.mulf %73, %62 : vector<2x64xf32>
    %78 = arith.mulf %72, %76 : vector<2x64xf32>
    %79 = arith.addf %77, %78 : vector<2x64xf32>
    %80 = math.tanh %79 : vector<2x64xf32>
    %81 = arith.mulf %74, %80 : vector<2x64xf32>
    %82 = vector.extract_strided_slice %60 {offsets = [2, 0], sizes = [2, 256], strides = [1, 1]} : vector<32x256xf32> to vector<2x256xf32>
    %cst_39 = arith.constant dense<0.000000e+00> : vector<2x256xf32>
    %83 = tpu.matmul %81, %56, %cst_39 {dimension_numbers = #tpu.dot_dimension_numbers<[1], [0], [0], [1], [0, 0, 1, 1], [], []>} : vector<2x64xf32>, vector<64x256xf32>, vector<2x256xf32> -> vector<2x256xf32>
    %84 = arith.addf %82, %83 : vector<2x256xf32>
    %85 = vector.extract_strided_slice %84 {offsets = [0, 0], sizes = [2, 192], strides = [1, 1]} : vector<2x256xf32> to vector<2x192xf32>
    %86 = arith.negf %85 : vector<2x192xf32>
    %87 = math.exp %86 : vector<2x192xf32>
    %cst_40 = arith.constant 1.000000e+00 : f32
    %88 = vector.broadcast %cst_40 : f32 to vector<2x192xf32>
    %89 = arith.addf %88, %87 : vector<2x192xf32>
    %90 = arith.divf %88, %89 : vector<2x192xf32>
    %91 = vector.extract_strided_slice %90 {offsets = [0, 0], sizes = [2, 64], strides = [1, 1]} : vector<2x192xf32> to vector<2x64xf32>
    %92 = vector.extract_strided_slice %90 {offsets = [0, 64], sizes = [2, 64], strides = [1, 1]} : vector<2x192xf32> to vector<2x64xf32>
    %93 = vector.extract_strided_slice %90 {offsets = [0, 128], sizes = [2, 64], strides = [1, 1]} : vector<2x192xf32> to vector<2x64xf32>
    %94 = vector.extract_strided_slice %84 {offsets = [0, 192], sizes = [2, 64], strides = [1, 1]} : vector<2x256xf32> to vector<2x64xf32>
    %95 = math.tanh %94 : vector<2x64xf32>
    %96 = arith.mulf %92, %79 : vector<2x64xf32>
    %97 = arith.mulf %91, %95 : vector<2x64xf32>
    %98 = arith.addf %96, %97 : vector<2x64xf32>
    %99 = math.tanh %98 : vector<2x64xf32>
    %100 = arith.mulf %93, %99 : vector<2x64xf32>
    %101 = vector.extract_strided_slice %60 {offsets = [4, 0], sizes = [2, 256], strides = [1, 1]} : vector<32x256xf32> to vector<2x256xf32>
    %cst_41 = arith.constant dense<0.000000e+00> : vector<2x256xf32>
    %102 = tpu.matmul %100, %56, %cst_41 {dimension_numbers = #tpu.dot_dimension_numbers<[1], [0], [0], [1], [0, 0, 1, 1], [], []>} : vector<2x64xf32>, vector<64x256xf32>, vector<2x256xf32> -> vector<2x256xf32>
    %103 = arith.addf %101, %102 : vector<2x256xf32>
    %104 = vector.extract_strided_slice %103 {offsets = [0, 0], sizes = [2, 192], strides = [1, 1]} : vector<2x256xf32> to vector<2x192xf32>
    %105 = arith.negf %104 : vector<2x192xf32>
    %106 = math.exp %105 : vector<2x192xf32>
    %cst_42 = arith.constant 1.000000e+00 : f32
    %107 = vector.broadcast %cst_42 : f32 to vector<2x192xf32>
    %108 = arith.addf %107, %106 : vector<2x192xf32>
    %109 = arith.divf %107, %108 : vector<2x192xf32>
    %110 = vector.extract_strided_slice %109 {offsets = [0, 0], sizes = [2, 64], strides = [1, 1]} : vector<2x192xf32> to vector<2x64xf32>
    %111 = vector.extract_strided_slice %109 {offsets = [0, 64], sizes = [2, 64], strides = [1, 1]} : vector<2x192xf32> to vector<2x64xf32>
    %112 = vector.extract_strided_slice %109 {offsets = [0, 128], sizes = [2, 64], strides = [1, 1]} : vector<2x192xf32> to vector<2x64xf32>
    %113 = vector.extract_strided_slice %103 {offsets = [0, 192], sizes = [2, 64], strides = [1, 1]} : vector<2x256xf32> to vector<2x64xf32>
    %114 = math.tanh %113 : vector<2x64xf32>
    %115 = arith.mulf %111, %98 : vector<2x64xf32>
    %116 = arith.mulf %110, %114 : vector<2x64xf32>
    %117 = arith.addf %115, %116 : vector<2x64xf32>
    %118 = math.tanh %117 : vector<2x64xf32>
    %119 = arith.mulf %112, %118 : vector<2x64xf32>
    %120 = vector.extract_strided_slice %60 {offsets = [6, 0], sizes = [2, 256], strides = [1, 1]} : vector<32x256xf32> to vector<2x256xf32>
    %cst_43 = arith.constant dense<0.000000e+00> : vector<2x256xf32>
    %121 = tpu.matmul %119, %56, %cst_43 {dimension_numbers = #tpu.dot_dimension_numbers<[1], [0], [0], [1], [0, 0, 1, 1], [], []>} : vector<2x64xf32>, vector<64x256xf32>, vector<2x256xf32> -> vector<2x256xf32>
    %122 = arith.addf %120, %121 : vector<2x256xf32>
    %123 = vector.extract_strided_slice %122 {offsets = [0, 0], sizes = [2, 192], strides = [1, 1]} : vector<2x256xf32> to vector<2x192xf32>
    %124 = arith.negf %123 : vector<2x192xf32>
    %125 = math.exp %124 : vector<2x192xf32>
    %cst_44 = arith.constant 1.000000e+00 : f32
    %126 = vector.broadcast %cst_44 : f32 to vector<2x192xf32>
    %127 = arith.addf %126, %125 : vector<2x192xf32>
    %128 = arith.divf %126, %127 : vector<2x192xf32>
    %129 = vector.extract_strided_slice %128 {offsets = [0, 0], sizes = [2, 64], strides = [1, 1]} : vector<2x192xf32> to vector<2x64xf32>
    %130 = vector.extract_strided_slice %128 {offsets = [0, 64], sizes = [2, 64], strides = [1, 1]} : vector<2x192xf32> to vector<2x64xf32>
    %131 = vector.extract_strided_slice %128 {offsets = [0, 128], sizes = [2, 64], strides = [1, 1]} : vector<2x192xf32> to vector<2x64xf32>
    %132 = vector.extract_strided_slice %122 {offsets = [0, 192], sizes = [2, 64], strides = [1, 1]} : vector<2x256xf32> to vector<2x64xf32>
    %133 = math.tanh %132 : vector<2x64xf32>
    %134 = arith.mulf %130, %117 : vector<2x64xf32>
    %135 = arith.mulf %129, %133 : vector<2x64xf32>
    %136 = arith.addf %134, %135 : vector<2x64xf32>
    %137 = math.tanh %136 : vector<2x64xf32>
    %138 = arith.mulf %131, %137 : vector<2x64xf32>
    %139 = vector.extract_strided_slice %60 {offsets = [8, 0], sizes = [2, 256], strides = [1, 1]} : vector<32x256xf32> to vector<2x256xf32>
    %cst_45 = arith.constant dense<0.000000e+00> : vector<2x256xf32>
    %140 = tpu.matmul %138, %56, %cst_45 {dimension_numbers = #tpu.dot_dimension_numbers<[1], [0], [0], [1], [0, 0, 1, 1], [], []>} : vector<2x64xf32>, vector<64x256xf32>, vector<2x256xf32> -> vector<2x256xf32>
    %141 = arith.addf %139, %140 : vector<2x256xf32>
    %142 = vector.extract_strided_slice %141 {offsets = [0, 0], sizes = [2, 192], strides = [1, 1]} : vector<2x256xf32> to vector<2x192xf32>
    %143 = arith.negf %142 : vector<2x192xf32>
    %144 = math.exp %143 : vector<2x192xf32>
    %cst_46 = arith.constant 1.000000e+00 : f32
    %145 = vector.broadcast %cst_46 : f32 to vector<2x192xf32>
    %146 = arith.addf %145, %144 : vector<2x192xf32>
    %147 = arith.divf %145, %146 : vector<2x192xf32>
    %148 = vector.extract_strided_slice %147 {offsets = [0, 0], sizes = [2, 64], strides = [1, 1]} : vector<2x192xf32> to vector<2x64xf32>
    %149 = vector.extract_strided_slice %147 {offsets = [0, 64], sizes = [2, 64], strides = [1, 1]} : vector<2x192xf32> to vector<2x64xf32>
    %150 = vector.extract_strided_slice %147 {offsets = [0, 128], sizes = [2, 64], strides = [1, 1]} : vector<2x192xf32> to vector<2x64xf32>
    %151 = vector.extract_strided_slice %141 {offsets = [0, 192], sizes = [2, 64], strides = [1, 1]} : vector<2x256xf32> to vector<2x64xf32>
    %152 = math.tanh %151 : vector<2x64xf32>
    %153 = arith.mulf %149, %136 : vector<2x64xf32>
    %154 = arith.mulf %148, %152 : vector<2x64xf32>
    %155 = arith.addf %153, %154 : vector<2x64xf32>
    %156 = math.tanh %155 : vector<2x64xf32>
    %157 = arith.mulf %150, %156 : vector<2x64xf32>
    %158 = vector.extract_strided_slice %60 {offsets = [10, 0], sizes = [2, 256], strides = [1, 1]} : vector<32x256xf32> to vector<2x256xf32>
    %cst_47 = arith.constant dense<0.000000e+00> : vector<2x256xf32>
    %159 = tpu.matmul %157, %56, %cst_47 {dimension_numbers = #tpu.dot_dimension_numbers<[1], [0], [0], [1], [0, 0, 1, 1], [], []>} : vector<2x64xf32>, vector<64x256xf32>, vector<2x256xf32> -> vector<2x256xf32>
    %160 = arith.addf %158, %159 : vector<2x256xf32>
    %161 = vector.extract_strided_slice %160 {offsets = [0, 0], sizes = [2, 192], strides = [1, 1]} : vector<2x256xf32> to vector<2x192xf32>
    %162 = arith.negf %161 : vector<2x192xf32>
    %163 = math.exp %162 : vector<2x192xf32>
    %cst_48 = arith.constant 1.000000e+00 : f32
    %164 = vector.broadcast %cst_48 : f32 to vector<2x192xf32>
    %165 = arith.addf %164, %163 : vector<2x192xf32>
    %166 = arith.divf %164, %165 : vector<2x192xf32>
    %167 = vector.extract_strided_slice %166 {offsets = [0, 0], sizes = [2, 64], strides = [1, 1]} : vector<2x192xf32> to vector<2x64xf32>
    %168 = vector.extract_strided_slice %166 {offsets = [0, 64], sizes = [2, 64], strides = [1, 1]} : vector<2x192xf32> to vector<2x64xf32>
    %169 = vector.extract_strided_slice %166 {offsets = [0, 128], sizes = [2, 64], strides = [1, 1]} : vector<2x192xf32> to vector<2x64xf32>
    %170 = vector.extract_strided_slice %160 {offsets = [0, 192], sizes = [2, 64], strides = [1, 1]} : vector<2x256xf32> to vector<2x64xf32>
    %171 = math.tanh %170 : vector<2x64xf32>
    %172 = arith.mulf %168, %155 : vector<2x64xf32>
    %173 = arith.mulf %167, %171 : vector<2x64xf32>
    %174 = arith.addf %172, %173 : vector<2x64xf32>
    %175 = math.tanh %174 : vector<2x64xf32>
    %176 = arith.mulf %169, %175 : vector<2x64xf32>
    %177 = vector.extract_strided_slice %60 {offsets = [12, 0], sizes = [2, 256], strides = [1, 1]} : vector<32x256xf32> to vector<2x256xf32>
    %cst_49 = arith.constant dense<0.000000e+00> : vector<2x256xf32>
    %178 = tpu.matmul %176, %56, %cst_49 {dimension_numbers = #tpu.dot_dimension_numbers<[1], [0], [0], [1], [0, 0, 1, 1], [], []>} : vector<2x64xf32>, vector<64x256xf32>, vector<2x256xf32> -> vector<2x256xf32>
    %179 = arith.addf %177, %178 : vector<2x256xf32>
    %180 = vector.extract_strided_slice %179 {offsets = [0, 0], sizes = [2, 192], strides = [1, 1]} : vector<2x256xf32> to vector<2x192xf32>
    %181 = arith.negf %180 : vector<2x192xf32>
    %182 = math.exp %181 : vector<2x192xf32>
    %cst_50 = arith.constant 1.000000e+00 : f32
    %183 = vector.broadcast %cst_50 : f32 to vector<2x192xf32>
    %184 = arith.addf %183, %182 : vector<2x192xf32>
    %185 = arith.divf %183, %184 : vector<2x192xf32>
    %186 = vector.extract_strided_slice %185 {offsets = [0, 0], sizes = [2, 64], strides = [1, 1]} : vector<2x192xf32> to vector<2x64xf32>
    %187 = vector.extract_strided_slice %185 {offsets = [0, 64], sizes = [2, 64], strides = [1, 1]} : vector<2x192xf32> to vector<2x64xf32>
    %188 = vector.extract_strided_slice %185 {offsets = [0, 128], sizes = [2, 64], strides = [1, 1]} : vector<2x192xf32> to vector<2x64xf32>
    %189 = vector.extract_strided_slice %179 {offsets = [0, 192], sizes = [2, 64], strides = [1, 1]} : vector<2x256xf32> to vector<2x64xf32>
    %190 = math.tanh %189 : vector<2x64xf32>
    %191 = arith.mulf %187, %174 : vector<2x64xf32>
    %192 = arith.mulf %186, %190 : vector<2x64xf32>
    %193 = arith.addf %191, %192 : vector<2x64xf32>
    %194 = math.tanh %193 : vector<2x64xf32>
    %195 = arith.mulf %188, %194 : vector<2x64xf32>
    %196 = vector.extract_strided_slice %60 {offsets = [14, 0], sizes = [2, 256], strides = [1, 1]} : vector<32x256xf32> to vector<2x256xf32>
    %cst_51 = arith.constant dense<0.000000e+00> : vector<2x256xf32>
    %197 = tpu.matmul %195, %56, %cst_51 {dimension_numbers = #tpu.dot_dimension_numbers<[1], [0], [0], [1], [0, 0, 1, 1], [], []>} : vector<2x64xf32>, vector<64x256xf32>, vector<2x256xf32> -> vector<2x256xf32>
    %198 = arith.addf %196, %197 : vector<2x256xf32>
    %199 = vector.extract_strided_slice %198 {offsets = [0, 0], sizes = [2, 192], strides = [1, 1]} : vector<2x256xf32> to vector<2x192xf32>
    %200 = arith.negf %199 : vector<2x192xf32>
    %201 = math.exp %200 : vector<2x192xf32>
    %cst_52 = arith.constant 1.000000e+00 : f32
    %202 = vector.broadcast %cst_52 : f32 to vector<2x192xf32>
    %203 = arith.addf %202, %201 : vector<2x192xf32>
    %204 = arith.divf %202, %203 : vector<2x192xf32>
    %205 = vector.extract_strided_slice %204 {offsets = [0, 0], sizes = [2, 64], strides = [1, 1]} : vector<2x192xf32> to vector<2x64xf32>
    %206 = vector.extract_strided_slice %204 {offsets = [0, 64], sizes = [2, 64], strides = [1, 1]} : vector<2x192xf32> to vector<2x64xf32>
    %207 = vector.extract_strided_slice %204 {offsets = [0, 128], sizes = [2, 64], strides = [1, 1]} : vector<2x192xf32> to vector<2x64xf32>
    %208 = vector.extract_strided_slice %198 {offsets = [0, 192], sizes = [2, 64], strides = [1, 1]} : vector<2x256xf32> to vector<2x64xf32>
    %209 = math.tanh %208 : vector<2x64xf32>
    %210 = arith.mulf %206, %193 : vector<2x64xf32>
    %211 = arith.mulf %205, %209 : vector<2x64xf32>
    %212 = arith.addf %210, %211 : vector<2x64xf32>
    %213 = math.tanh %212 : vector<2x64xf32>
    %214 = arith.mulf %207, %213 : vector<2x64xf32>
    %215 = vector.extract_strided_slice %60 {offsets = [16, 0], sizes = [2, 256], strides = [1, 1]} : vector<32x256xf32> to vector<2x256xf32>
    %cst_53 = arith.constant dense<0.000000e+00> : vector<2x256xf32>
    %216 = tpu.matmul %214, %56, %cst_53 {dimension_numbers = #tpu.dot_dimension_numbers<[1], [0], [0], [1], [0, 0, 1, 1], [], []>} : vector<2x64xf32>, vector<64x256xf32>, vector<2x256xf32> -> vector<2x256xf32>
    %217 = arith.addf %215, %216 : vector<2x256xf32>
    %218 = vector.extract_strided_slice %217 {offsets = [0, 0], sizes = [2, 192], strides = [1, 1]} : vector<2x256xf32> to vector<2x192xf32>
    %219 = arith.negf %218 : vector<2x192xf32>
    %220 = math.exp %219 : vector<2x192xf32>
    %cst_54 = arith.constant 1.000000e+00 : f32
    %221 = vector.broadcast %cst_54 : f32 to vector<2x192xf32>
    %222 = arith.addf %221, %220 : vector<2x192xf32>
    %223 = arith.divf %221, %222 : vector<2x192xf32>
    %224 = vector.extract_strided_slice %223 {offsets = [0, 0], sizes = [2, 64], strides = [1, 1]} : vector<2x192xf32> to vector<2x64xf32>
    %225 = vector.extract_strided_slice %223 {offsets = [0, 64], sizes = [2, 64], strides = [1, 1]} : vector<2x192xf32> to vector<2x64xf32>
    %226 = vector.extract_strided_slice %223 {offsets = [0, 128], sizes = [2, 64], strides = [1, 1]} : vector<2x192xf32> to vector<2x64xf32>
    %227 = vector.extract_strided_slice %217 {offsets = [0, 192], sizes = [2, 64], strides = [1, 1]} : vector<2x256xf32> to vector<2x64xf32>
    %228 = math.tanh %227 : vector<2x64xf32>
    %229 = arith.mulf %225, %212 : vector<2x64xf32>
    %230 = arith.mulf %224, %228 : vector<2x64xf32>
    %231 = arith.addf %229, %230 : vector<2x64xf32>
    %232 = math.tanh %231 : vector<2x64xf32>
    %233 = arith.mulf %226, %232 : vector<2x64xf32>
    %234 = vector.extract_strided_slice %60 {offsets = [18, 0], sizes = [2, 256], strides = [1, 1]} : vector<32x256xf32> to vector<2x256xf32>
    %cst_55 = arith.constant dense<0.000000e+00> : vector<2x256xf32>
    %235 = tpu.matmul %233, %56, %cst_55 {dimension_numbers = #tpu.dot_dimension_numbers<[1], [0], [0], [1], [0, 0, 1, 1], [], []>} : vector<2x64xf32>, vector<64x256xf32>, vector<2x256xf32> -> vector<2x256xf32>
    %236 = arith.addf %234, %235 : vector<2x256xf32>
    %237 = vector.extract_strided_slice %236 {offsets = [0, 0], sizes = [2, 192], strides = [1, 1]} : vector<2x256xf32> to vector<2x192xf32>
    %238 = arith.negf %237 : vector<2x192xf32>
    %239 = math.exp %238 : vector<2x192xf32>
    %cst_56 = arith.constant 1.000000e+00 : f32
    %240 = vector.broadcast %cst_56 : f32 to vector<2x192xf32>
    %241 = arith.addf %240, %239 : vector<2x192xf32>
    %242 = arith.divf %240, %241 : vector<2x192xf32>
    %243 = vector.extract_strided_slice %242 {offsets = [0, 0], sizes = [2, 64], strides = [1, 1]} : vector<2x192xf32> to vector<2x64xf32>
    %244 = vector.extract_strided_slice %242 {offsets = [0, 64], sizes = [2, 64], strides = [1, 1]} : vector<2x192xf32> to vector<2x64xf32>
    %245 = vector.extract_strided_slice %242 {offsets = [0, 128], sizes = [2, 64], strides = [1, 1]} : vector<2x192xf32> to vector<2x64xf32>
    %246 = vector.extract_strided_slice %236 {offsets = [0, 192], sizes = [2, 64], strides = [1, 1]} : vector<2x256xf32> to vector<2x64xf32>
    %247 = math.tanh %246 : vector<2x64xf32>
    %248 = arith.mulf %244, %231 : vector<2x64xf32>
    %249 = arith.mulf %243, %247 : vector<2x64xf32>
    %250 = arith.addf %248, %249 : vector<2x64xf32>
    %251 = math.tanh %250 : vector<2x64xf32>
    %252 = arith.mulf %245, %251 : vector<2x64xf32>
    %253 = vector.extract_strided_slice %60 {offsets = [20, 0], sizes = [2, 256], strides = [1, 1]} : vector<32x256xf32> to vector<2x256xf32>
    %cst_57 = arith.constant dense<0.000000e+00> : vector<2x256xf32>
    %254 = tpu.matmul %252, %56, %cst_57 {dimension_numbers = #tpu.dot_dimension_numbers<[1], [0], [0], [1], [0, 0, 1, 1], [], []>} : vector<2x64xf32>, vector<64x256xf32>, vector<2x256xf32> -> vector<2x256xf32>
    %255 = arith.addf %253, %254 : vector<2x256xf32>
    %256 = vector.extract_strided_slice %255 {offsets = [0, 0], sizes = [2, 192], strides = [1, 1]} : vector<2x256xf32> to vector<2x192xf32>
    %257 = arith.negf %256 : vector<2x192xf32>
    %258 = math.exp %257 : vector<2x192xf32>
    %cst_58 = arith.constant 1.000000e+00 : f32
    %259 = vector.broadcast %cst_58 : f32 to vector<2x192xf32>
    %260 = arith.addf %259, %258 : vector<2x192xf32>
    %261 = arith.divf %259, %260 : vector<2x192xf32>
    %262 = vector.extract_strided_slice %261 {offsets = [0, 0], sizes = [2, 64], strides = [1, 1]} : vector<2x192xf32> to vector<2x64xf32>
    %263 = vector.extract_strided_slice %261 {offsets = [0, 64], sizes = [2, 64], strides = [1, 1]} : vector<2x192xf32> to vector<2x64xf32>
    %264 = vector.extract_strided_slice %261 {offsets = [0, 128], sizes = [2, 64], strides = [1, 1]} : vector<2x192xf32> to vector<2x64xf32>
    %265 = vector.extract_strided_slice %255 {offsets = [0, 192], sizes = [2, 64], strides = [1, 1]} : vector<2x256xf32> to vector<2x64xf32>
    %266 = math.tanh %265 : vector<2x64xf32>
    %267 = arith.mulf %263, %250 : vector<2x64xf32>
    %268 = arith.mulf %262, %266 : vector<2x64xf32>
    %269 = arith.addf %267, %268 : vector<2x64xf32>
    %270 = math.tanh %269 : vector<2x64xf32>
    %271 = arith.mulf %264, %270 : vector<2x64xf32>
    %272 = vector.extract_strided_slice %60 {offsets = [22, 0], sizes = [2, 256], strides = [1, 1]} : vector<32x256xf32> to vector<2x256xf32>
    %cst_59 = arith.constant dense<0.000000e+00> : vector<2x256xf32>
    %273 = tpu.matmul %271, %56, %cst_59 {dimension_numbers = #tpu.dot_dimension_numbers<[1], [0], [0], [1], [0, 0, 1, 1], [], []>} : vector<2x64xf32>, vector<64x256xf32>, vector<2x256xf32> -> vector<2x256xf32>
    %274 = arith.addf %272, %273 : vector<2x256xf32>
    %275 = vector.extract_strided_slice %274 {offsets = [0, 0], sizes = [2, 192], strides = [1, 1]} : vector<2x256xf32> to vector<2x192xf32>
    %276 = arith.negf %275 : vector<2x192xf32>
    %277 = math.exp %276 : vector<2x192xf32>
    %cst_60 = arith.constant 1.000000e+00 : f32
    %278 = vector.broadcast %cst_60 : f32 to vector<2x192xf32>
    %279 = arith.addf %278, %277 : vector<2x192xf32>
    %280 = arith.divf %278, %279 : vector<2x192xf32>
    %281 = vector.extract_strided_slice %280 {offsets = [0, 0], sizes = [2, 64], strides = [1, 1]} : vector<2x192xf32> to vector<2x64xf32>
    %282 = vector.extract_strided_slice %280 {offsets = [0, 64], sizes = [2, 64], strides = [1, 1]} : vector<2x192xf32> to vector<2x64xf32>
    %283 = vector.extract_strided_slice %280 {offsets = [0, 128], sizes = [2, 64], strides = [1, 1]} : vector<2x192xf32> to vector<2x64xf32>
    %284 = vector.extract_strided_slice %274 {offsets = [0, 192], sizes = [2, 64], strides = [1, 1]} : vector<2x256xf32> to vector<2x64xf32>
    %285 = math.tanh %284 : vector<2x64xf32>
    %286 = arith.mulf %282, %269 : vector<2x64xf32>
    %287 = arith.mulf %281, %285 : vector<2x64xf32>
    %288 = arith.addf %286, %287 : vector<2x64xf32>
    %289 = math.tanh %288 : vector<2x64xf32>
    %290 = arith.mulf %283, %289 : vector<2x64xf32>
    %291 = vector.extract_strided_slice %60 {offsets = [24, 0], sizes = [2, 256], strides = [1, 1]} : vector<32x256xf32> to vector<2x256xf32>
    %cst_61 = arith.constant dense<0.000000e+00> : vector<2x256xf32>
    %292 = tpu.matmul %290, %56, %cst_61 {dimension_numbers = #tpu.dot_dimension_numbers<[1], [0], [0], [1], [0, 0, 1, 1], [], []>} : vector<2x64xf32>, vector<64x256xf32>, vector<2x256xf32> -> vector<2x256xf32>
    %293 = arith.addf %291, %292 : vector<2x256xf32>
    %294 = vector.extract_strided_slice %293 {offsets = [0, 0], sizes = [2, 192], strides = [1, 1]} : vector<2x256xf32> to vector<2x192xf32>
    %295 = arith.negf %294 : vector<2x192xf32>
    %296 = math.exp %295 : vector<2x192xf32>
    %cst_62 = arith.constant 1.000000e+00 : f32
    %297 = vector.broadcast %cst_62 : f32 to vector<2x192xf32>
    %298 = arith.addf %297, %296 : vector<2x192xf32>
    %299 = arith.divf %297, %298 : vector<2x192xf32>
    %300 = vector.extract_strided_slice %299 {offsets = [0, 0], sizes = [2, 64], strides = [1, 1]} : vector<2x192xf32> to vector<2x64xf32>
    %301 = vector.extract_strided_slice %299 {offsets = [0, 64], sizes = [2, 64], strides = [1, 1]} : vector<2x192xf32> to vector<2x64xf32>
    %302 = vector.extract_strided_slice %299 {offsets = [0, 128], sizes = [2, 64], strides = [1, 1]} : vector<2x192xf32> to vector<2x64xf32>
    %303 = vector.extract_strided_slice %293 {offsets = [0, 192], sizes = [2, 64], strides = [1, 1]} : vector<2x256xf32> to vector<2x64xf32>
    %304 = math.tanh %303 : vector<2x64xf32>
    %305 = arith.mulf %301, %288 : vector<2x64xf32>
    %306 = arith.mulf %300, %304 : vector<2x64xf32>
    %307 = arith.addf %305, %306 : vector<2x64xf32>
    %308 = math.tanh %307 : vector<2x64xf32>
    %309 = arith.mulf %302, %308 : vector<2x64xf32>
    %310 = vector.extract_strided_slice %60 {offsets = [26, 0], sizes = [2, 256], strides = [1, 1]} : vector<32x256xf32> to vector<2x256xf32>
    %cst_63 = arith.constant dense<0.000000e+00> : vector<2x256xf32>
    %311 = tpu.matmul %309, %56, %cst_63 {dimension_numbers = #tpu.dot_dimension_numbers<[1], [0], [0], [1], [0, 0, 1, 1], [], []>} : vector<2x64xf32>, vector<64x256xf32>, vector<2x256xf32> -> vector<2x256xf32>
    %312 = arith.addf %310, %311 : vector<2x256xf32>
    %313 = vector.extract_strided_slice %312 {offsets = [0, 0], sizes = [2, 192], strides = [1, 1]} : vector<2x256xf32> to vector<2x192xf32>
    %314 = arith.negf %313 : vector<2x192xf32>
    %315 = math.exp %314 : vector<2x192xf32>
    %cst_64 = arith.constant 1.000000e+00 : f32
    %316 = vector.broadcast %cst_64 : f32 to vector<2x192xf32>
    %317 = arith.addf %316, %315 : vector<2x192xf32>
    %318 = arith.divf %316, %317 : vector<2x192xf32>
    %319 = vector.extract_strided_slice %318 {offsets = [0, 0], sizes = [2, 64], strides = [1, 1]} : vector<2x192xf32> to vector<2x64xf32>
    %320 = vector.extract_strided_slice %318 {offsets = [0, 64], sizes = [2, 64], strides = [1, 1]} : vector<2x192xf32> to vector<2x64xf32>
    %321 = vector.extract_strided_slice %318 {offsets = [0, 128], sizes = [2, 64], strides = [1, 1]} : vector<2x192xf32> to vector<2x64xf32>
    %322 = vector.extract_strided_slice %312 {offsets = [0, 192], sizes = [2, 64], strides = [1, 1]} : vector<2x256xf32> to vector<2x64xf32>
    %323 = math.tanh %322 : vector<2x64xf32>
    %324 = arith.mulf %320, %307 : vector<2x64xf32>
    %325 = arith.mulf %319, %323 : vector<2x64xf32>
    %326 = arith.addf %324, %325 : vector<2x64xf32>
    %327 = math.tanh %326 : vector<2x64xf32>
    %328 = arith.mulf %321, %327 : vector<2x64xf32>
    %329 = vector.extract_strided_slice %60 {offsets = [28, 0], sizes = [2, 256], strides = [1, 1]} : vector<32x256xf32> to vector<2x256xf32>
    %cst_65 = arith.constant dense<0.000000e+00> : vector<2x256xf32>
    %330 = tpu.matmul %328, %56, %cst_65 {dimension_numbers = #tpu.dot_dimension_numbers<[1], [0], [0], [1], [0, 0, 1, 1], [], []>} : vector<2x64xf32>, vector<64x256xf32>, vector<2x256xf32> -> vector<2x256xf32>
    %331 = arith.addf %329, %330 : vector<2x256xf32>
    %332 = vector.extract_strided_slice %331 {offsets = [0, 0], sizes = [2, 192], strides = [1, 1]} : vector<2x256xf32> to vector<2x192xf32>
    %333 = arith.negf %332 : vector<2x192xf32>
    %334 = math.exp %333 : vector<2x192xf32>
    %cst_66 = arith.constant 1.000000e+00 : f32
    %335 = vector.broadcast %cst_66 : f32 to vector<2x192xf32>
    %336 = arith.addf %335, %334 : vector<2x192xf32>
    %337 = arith.divf %335, %336 : vector<2x192xf32>
    %338 = vector.extract_strided_slice %337 {offsets = [0, 0], sizes = [2, 64], strides = [1, 1]} : vector<2x192xf32> to vector<2x64xf32>
    %339 = vector.extract_strided_slice %337 {offsets = [0, 64], sizes = [2, 64], strides = [1, 1]} : vector<2x192xf32> to vector<2x64xf32>
    %340 = vector.extract_strided_slice %337 {offsets = [0, 128], sizes = [2, 64], strides = [1, 1]} : vector<2x192xf32> to vector<2x64xf32>
    %341 = vector.extract_strided_slice %331 {offsets = [0, 192], sizes = [2, 64], strides = [1, 1]} : vector<2x256xf32> to vector<2x64xf32>
    %342 = math.tanh %341 : vector<2x64xf32>
    %343 = arith.mulf %339, %326 : vector<2x64xf32>
    %344 = arith.mulf %338, %342 : vector<2x64xf32>
    %345 = arith.addf %343, %344 : vector<2x64xf32>
    %346 = math.tanh %345 : vector<2x64xf32>
    %347 = arith.mulf %340, %346 : vector<2x64xf32>
    %348 = vector.extract_strided_slice %60 {offsets = [30, 0], sizes = [2, 256], strides = [1, 1]} : vector<32x256xf32> to vector<2x256xf32>
    %cst_67 = arith.constant dense<0.000000e+00> : vector<2x256xf32>
    %349 = tpu.matmul %347, %56, %cst_67 {dimension_numbers = #tpu.dot_dimension_numbers<[1], [0], [0], [1], [0, 0, 1, 1], [], []>} : vector<2x64xf32>, vector<64x256xf32>, vector<2x256xf32> -> vector<2x256xf32>
    %350 = arith.addf %348, %349 : vector<2x256xf32>
    %351 = vector.extract_strided_slice %350 {offsets = [0, 0], sizes = [2, 192], strides = [1, 1]} : vector<2x256xf32> to vector<2x192xf32>
    %352 = arith.negf %351 : vector<2x192xf32>
    %353 = math.exp %352 : vector<2x192xf32>
    %cst_68 = arith.constant 1.000000e+00 : f32
    %354 = vector.broadcast %cst_68 : f32 to vector<2x192xf32>
    %355 = arith.addf %354, %353 : vector<2x192xf32>
    %356 = arith.divf %354, %355 : vector<2x192xf32>
    %357 = vector.extract_strided_slice %356 {offsets = [0, 0], sizes = [2, 64], strides = [1, 1]} : vector<2x192xf32> to vector<2x64xf32>
    %358 = vector.extract_strided_slice %356 {offsets = [0, 64], sizes = [2, 64], strides = [1, 1]} : vector<2x192xf32> to vector<2x64xf32>
    %359 = vector.extract_strided_slice %356 {offsets = [0, 128], sizes = [2, 64], strides = [1, 1]} : vector<2x192xf32> to vector<2x64xf32>
    %360 = vector.extract_strided_slice %350 {offsets = [0, 192], sizes = [2, 64], strides = [1, 1]} : vector<2x256xf32> to vector<2x64xf32>
    %361 = math.tanh %360 : vector<2x64xf32>
    %362 = arith.mulf %358, %345 : vector<2x64xf32>
    %363 = arith.mulf %357, %361 : vector<2x64xf32>
    %364 = arith.addf %362, %363 : vector<2x64xf32>
    %365 = math.tanh %364 : vector<2x64xf32>
    %366 = arith.mulf %359, %365 : vector<2x64xf32>
    %c0_69 = arith.constant 0 : index
    %c0_70 = arith.constant 0 : index
    %367 = vector.load %arg4[%c0_69, %c0_70] : memref<73x64xf32, #tpu.memory_space<vmem>>, vector<64x64xf32>
    %c64_71 = arith.constant 64 : index
    %c0_72 = arith.constant 0 : index
    %368 = vector.load %arg4[%c64_71, %c0_72] : memref<73x64xf32, #tpu.memory_space<vmem>>, vector<4x64xf32>
    %c72 = arith.constant 72 : index
    %c0_73 = arith.constant 0 : index
    %369 = vector.load %arg4[%c72, %c0_73] : memref<73x64xf32, #tpu.memory_space<vmem>>, vector<1x64xf32>
    %cst_74 = arith.constant dense<0.000000e+00> : vector<2x64xf32>
    %370 = tpu.matmul %366, %367, %cst_74 {dimension_numbers = #tpu.dot_dimension_numbers<[1], [0], [0], [1], [0, 0, 1, 1], [], []>} : vector<2x64xf32>, vector<64x64xf32>, vector<2x64xf32> -> vector<2x64xf32>
    %c0_75 = arith.constant 0 : index
    %c0_76 = arith.constant 0 : index
    %371 = vector.load %arg1[%c0_75, %c0_76] : memref<2x4xf32, #tpu.memory_space<vmem>>, vector<2x4xf32>
    %cst_77 = arith.constant dense<0.000000e+00> : vector<2x64xf32>
    %372 = tpu.matmul %371, %368, %cst_77 {dimension_numbers = #tpu.dot_dimension_numbers<[1], [0], [0], [1], [0, 0, 1, 1], [], []>} : vector<2x4xf32>, vector<4x64xf32>, vector<2x64xf32> -> vector<2x64xf32>
    %373 = arith.addf %370, %372 : vector<2x64xf32>
    %374 = vector.broadcast %369 : vector<1x64xf32> to vector<2x64xf32>
    %375 = arith.addf %373, %374 : vector<2x64xf32>
    %cst_78 = arith.constant 0.000000e+00 : f32
    %376 = vector.broadcast %cst_78 : f32 to vector<2x64xf32>
    %377 = arith.maximumf %375, %376 : vector<2x64xf32>
    %c0_79 = arith.constant 0 : index
    %c0_80 = arith.constant 0 : index
    %378 = vector.load %arg5[%c0_79, %c0_80] : memref<65x5xf32, #tpu.memory_space<vmem>>, vector<64x5xf32>
    %c64_81 = arith.constant 64 : index
    %c0_82 = arith.constant 0 : index
    %379 = vector.load %arg5[%c64_81, %c0_82] : memref<65x5xf32, #tpu.memory_space<vmem>>, vector<1x5xf32>
    %cst_83 = arith.constant dense<0.000000e+00> : vector<2x5xf32>
    %380 = tpu.matmul %377, %378, %cst_83 {dimension_numbers = #tpu.dot_dimension_numbers<[1], [0], [0], [1], [0, 0, 1, 1], [], []>} : vector<2x64xf32>, vector<64x5xf32>, vector<2x5xf32> -> vector<2x5xf32>
    %381 = vector.broadcast %379 : vector<1x5xf32> to vector<2x5xf32>
    %382 = arith.addf %380, %381 : vector<2x5xf32>
    %c0_84 = arith.constant 0 : index
    %c0_85 = arith.constant 0 : index
    %383 = vector.load %arg6[%c0_84, %c0_85] : memref<2x5xf32, #tpu.memory_space<vmem>>, vector<2x5xf32>
    tpu.vector_store %arg6[%c0_84, %c0_85], %382 {strides = array<i32>} : memref<2x5xf32, #tpu.memory_space<vmem>>, vector<2x5xf32>,
    return
  }
}

</mosaic_0001>

<bundles_post_ra>
// kernel: tpu_custom_call.1
= control target key start
LH: loop header
LB: loop body
LE: loop exit
PB: predicated region body
PF: predicated region fallthrough
CT: control target
= control target key end

     0   :  { %vm32_vm0 = vcmask 1041408   ;;  %vm46_vm1 = vcmask 64512   ;;  %s4794_s0 = inlined_call_operand.vmem [shape: f32[32,8], index: 0, kind: input, shape index: {}]   ;;  %s4795_s1 = inlined_call_operand.vmem [shape: f32[2,4], index: 1, kind: input, shape index: {}]   ;;  %s4796_s2 = inlined_call_operand.vmem [shape: f32[233,32], index: 2, kind: input, shape index: {}]   ;;  %s4797_s3 = inlined_call_operand.vmem [shape: f32[97,256], index: 3, kind: input, shape index: {}]   ;;  %s4798_s4 = inlined_call_operand.vmem [shape: f32[73,64], index: 4, kind: input, shape index: {}]   ;;  %s4799_s5 = inlined_call_operand.vmem [shape: f32[65,5], index: 5, kind: input, shape index: {}]   ;;  %s4800_s6 = inlined_call_operand.hbm [shape: f32[2,5], index: 6, kind: output, shape index: {}]  }
   0x1   :  { %v149_v0 = vld [vmem:[%s4796_s2 + $0x8] sm:$0xff]  ;;  %v24_v1 = vld [vmem:[%s4794_s0] sm:$0xff]  ;;  %v258_v5 = vld [vmem:[%s4796_s2 + $0x10] sm:$0xff] }
   0x2   :  { %v25_v2 = vld [vmem:[%s4794_s0 + $0x8] sm:$0xff]  ;;  %3424 = vmatprep.subr.mxu0 %v149_v0  ;;  %v33_v3 = vrot.slane %v24_v1, 6  ;;  %v26_v6 = vld [vmem:[%s4794_s0 + $0x10] sm:$0xff]  ;;  %v45_v7 = vld [vmem:[%s4796_s2] sm:$0xff] }
   0x3   :  { %v34_v4 = vrot.slane %v25_v2, 6  ;;  %3425 = vmatpush3.msra.mxu0 %v149_v0  ;;  %v36_v8 = vrot.slane %v26_v6, 6  ;;  %3416 = vmatprep.subr.mxu1 %v45_v7  ;;  %v27_v9 = vld [vmem:[%s4794_s0 + $0x18] sm:$0xff] }
   0x4   :  { %11 = vsyncpa [#allocation3], 0  ;;  %v42_v11 = vsel %vm32_vm0, 0.0, %v33_v3  ;;  %vm151_vm2 = vcmask 1045504   ;;  %3432 = vmatprep.subr.mxu0 %v258_v5  ;;  %v38_v12 = vrot.slane %v27_v9, 6  ;;  %3417 = vmatpush3.msra.mxu1 %v45_v7  ;;  %vm259_vm3 = vcmask 1043456  }
   0x5   :  { %v35_v10 = vsel %vm32_vm0, %v33_v3, %v34_v4  ;;  %v152_v13 = vrot.slane %v42_v11, 2  ;;  %v37_v15 = vsel %vm32_vm0, %v34_v4, %v36_v8  ;;  %3418 = vmatprep.mubr.msk.f32.mxu1 %vm46_vm1, %v42_v11  ;;  %v260_v19 = vrot.slane %v42_v11, 4  ;;  %v386_v34 = vld [vmem:[%s4796_s2 + $0x20] sm:$0xff]  ;;  %v387_v35 = vld [vmem:[%s4796_s2 + $0x28] sm:$0xff]  ;;  %v388_v37 = vld [vmem:[%s4796_s2 + $0x30] sm:$0xff]  ;;  %s4164_s24 = smov [#allocation2]  }
   0x6   :  { %v153_v14 = vrot.slane %v35_v10, 2  ;;  %v155_v16 = vrot.slane %v37_v15, 2  ;;  %v39_v17 = vsel %vm32_vm0, %v36_v8, %v38_v12  ;;  %v43_v18 = vsel %vm32_vm0, %v38_v12, 0.0  ;;  %3419 = vmatmul.mubr.msk.f32.vlgmr.msra.gmra.mrb[0].mxu1 %vm46_vm1, %v35_v10  ;;  %v389_v38 = vld [vmem:[%s4796_s2 + $0x38] sm:$0xff]  ;;  %v493_v40 = vld [vmem:[%s4796_s2 + $0x40] sm:$0xff]  ;;  %v494_v41 = vld [vmem:[%s4796_s2 + $0x48] sm:$0xff] }
   0x7   :  { %v157_v21 = vrot.slane %v39_v17, 2  ;;  %v159_v22 = vrot.slane %v43_v18, 2  ;;  %v261_v23 = vrot.slane %v35_v10, 4  ;;  %3421 = vmatprep.mubr.msk.f32.mxu1 %vm46_vm1, %v37_v15  ;;  %v263_v26 = vrot.slane %v37_v15, 4  ;;  %v704_v43 = vld [vmem:[%s4796_s2 + $0x88] sm:$0xff]  ;;  %v705_v44 = vld [vmem:[%s4796_s2 + $0x90] sm:$0xff] }
   0x8   :  { %v154_v20 = vsel %vm151_vm2, %v152_v13, %v153_v14  ;;  %v156_v24 = vsel %vm151_vm2, %v153_v14, %v155_v16  ;;  %v265_v29 = vrot.slane %v39_v17, 4  ;;  %v267_v31 = vrot.slane %v43_v18, 4  ;;  %v3242_v48 = vld [vmem:[%s4796_s2 + $0x18] ss:$0 sm:$0xff]  ;;  %v495_v1 = vld [vmem:[%s4796_s2 + $0x50] sm:$0xff]  ;;  %v604_v13 = vld [vmem:[%s4796_s2 + $0x60] sm:$0xff] }
   0x9   :  { %3426 = vmatprep.mubr.msk.f32.mxu0 %vm46_vm1, %v154_v20  ;;  %v158_v25 = vsel %vm151_vm2, %v155_v16, %v157_v21  ;;  %v160_v27 = vsel %vm151_vm2, %v157_v21, %v159_v22  ;;  %v262_v28 = vsel %vm259_vm3, %v260_v19, %v261_v23  ;;  %v264_v30 = vsel %vm259_vm3, %v261_v23, %v263_v26  ;;  %v496_v2 = vld [vmem:[%s4796_s2 + $0x58] sm:$0xff]  ;;  %v605_v14 = vld [vmem:[%s4796_s2 + $0x68] sm:$0xff]  ;;  %s3230_s25 = sshll.u32 %s4164_s24, 4  ;;  %s3231_s25 = int_to_ptr.vmem [resolvable:$true] %s3230_s25 }
   0xa   :  { %3427 = vmatmul.mubr.msk.f32.vlgmr.msra.gmra.mrb[0].mxu0 %vm46_vm1, %v156_v24  ;;  %3422 = vmatmul.mubr.msk.f32.gmra.mrb[2].mxu1 %vm46_vm1, %v39_v17  ;;  %v266_v32 = vsel %vm259_vm3, %v263_v26, %v265_v29  ;;  %v268_v33 = vsel %vm259_vm3, %v265_v29, %v267_v31  ;;  %v3567_v36 = vpack.c.bf16 %v387_v35, %v386_v34  ;;  %vm390_vm4 = vcmask 261120   ;;  %v606_v24 = vld [vmem:[%s4796_s2 + $0x70] sm:$0xff]  ;;  %v707_v31 = vld [vmem:[%s4796_s2 + $0xa0] sm:$0xff]  ;;  %p4141_p1 = scmp.lt.s32.totalorder %s3231_s25, %s3231_s25 }
   0xb   :  { %3433 = vmatpush3.msra.mxu0 %v258_v5  ;;  %3429 = vmatprep.mubr.msk.f32.mxu0 %vm46_vm1, %v158_v25  ;;  %v3571_v39 = vpack.c.bf16 %v389_v38, %v388_v37  ;;  %v3575_v42 = vpack.c.bf16 %v494_v41, %v493_v40  ;;  %v3591_v45 = vpack.c.bf16 %v705_v44, %v704_v43  ;;  %v607_v25 = vld [vmem:[%s4796_s2 + $0x78] sm:$0xff]  ;;  %v814_v34 = vld [vmem:[%s4796_s2 + $0xb0] sm:$0xff]  ;;  %v1007_v37 = vld [vmem:[%s4797_s3 + $0x8] sm:$0xff]  ;;  %vm1144_vm5 = vcmask 523264  }
   0xc   :  { %3568 = vmatprep.subr.bf16.mxu1 %v3567_v36  ;;  %v3579_v9 = vpack.c.bf16 %v496_v2, %v495_v1  ;;  %v3583_v21 = vpack.c.bf16 %v605_v14, %v604_v13  ;;  %v3587_v29 = vpack.c.bf16 %v607_v25, %v606_v24  ;;  %v1009_v38 = vld [vmem:[%s4797_s3 + $0x18] sm:$0xff]  ;;  %v1008_v41 = vld [vmem:[%s4797_s3 + $0x10] sm:$0xff]  ;;  %v3255_v43 = vld [vmem:[%s4796_s2 + $0x80] ss:$0 sm:$0xff]  ;;  %vm2979_vm6 = vcmask 31744  }
   0xd   :  { %3570 = vmatpush3.bf16.msra.mxu1 %v3567_v36  ;;  %3592 = vmatprep.subr.bf16.mxu0 %v3591_v45  ;;  %v4160_v36 = vmov 0.0   ;;  %v3615_v40 = vpack.c.bf16 %v1009_v38, %v1007_v37  ;;  %v1011_v1 = vld [vmem:[%s4797_s3 + $0x28] sm:$0xff]  ;;  %v1013_v2 = vld [vmem:[%s4797_s3 + $0x38] sm:$0xff]  ;;  %vm4162_vm7 = vmmov 0   ;;  %vm3222_vm8 = vcmask 33792  }
   0xe   :  { %3430 = vmatmul.mubr.msk.f32.gmra.mrb[2].mxu0 %vm46_vm1, %v160_v27  ;;  %3572 = vmatprep.subr.bf16.mxu1 %v3571_v39  ;;  %v1019_v13 = vld [vmem:[%s4797_s3 + $0x68] sm:$0xff]  ;;  %v1021_v14 = vld [vmem:[%s4797_s3 + $0x78] sm:$0xff] }
   0xf   :  { %3434 = vmatprep.mubr.msk.f32.mxu0 %vm46_vm1, %v262_v28  ;;  %v1027_v25 = vld [vmem:[%s4797_s3 + $0xa8] sm:$0xff] }
  0x11   :  { %3574 = vmatpush3.bf16.msra.mxu1 %v3571_v39  ;;  %v1006_v39 = vld [vmem:[%s4797_s3] sm:$0xff] }
  0x12   :  { %3435 = vmatmul.mubr.msk.f32.vlgmr.msra.gmra.mrb[0].mxu0 %vm46_vm1, %v264_v30  ;;  %3576 = vmatprep.subr.bf16.mxu1 %v3575_v42  ;;  %v706_v30 = vld [vmem:[%s4796_s2 + $0x98] sm:$0xff] }
  0x13   :  { %3437 = vmatprep.mubr.msk.f32.mxu0 %vm46_vm1, %v266_v32  ;;  %3594 = vmatpush3.bf16.msra.mxu0 %v3591_v45  ;;  %v3595_v32 = vpack.c.bf16 %v707_v31, %v706_v30  ;;  %v3267_v31 = vld [vmem:[%s4796_s2 + $0xe8] ss:$0 sm:$0xff] }
  0x15   :  { %3596 = vmatprep.subr.bf16.mxu0 %v3595_v32 }
  0x16   :  { %3438 = vmatmul.mubr.msk.f32.gmra.mrb[2].mxu0 %vm46_vm1, %v268_v33  ;;  %v813_v33 = vld [vmem:[%s4796_s2 + $0xa8] sm:$0xff] }
  0x17   :  { %3598 = vmatpush3.bf16.msra.mxu0 %v3595_v32  ;;  %v3599_v35 = vpack.c.bf16 %v814_v34, %v813_v33  ;;  %3490 = vmatprep.mubr.f32.mxu0 %v4160_v36 }
  0x19   :  { %3600 = vmatprep.subr.bf16.mxu0 %v3599_v35 }
  0xd9   :  { %v3420_v46 = vpop.f32.mrb[0].mxu1 }
  0xda   :  { %v122_v47 = vpop.f32.mrb[1].mxu1  ;;  %v146_v51 = vadd.f32 %v3420_v46, %v3242_v48 }
  0xdb   :  { %v145_v52 = vadd.f32 %v3242_v48, %v122_v47  ;;  %v815_v47 = vld [vmem:[%s4796_s2 + $0xb8] sm:$0xff] }
  0xdd   :  { %v3423_v49 = vpop.f32.mrb[2].mxu1 }
  0xde   :  { %v132_v50 = vpop.f32.mrb[3].mxu1  ;;  %v148_v55 = vadd.f32 %v3423_v49, %v3242_v48 }
  0xdf   :  { %v147_v58 = vadd.f32 %v3242_v48, %v132_v50  ;;  %v816_v48 = vld [vmem:[%s4796_s2 + $0xc0] sm:$0xff] }
  0xe5   :  { %v3436_v53 = vpop.f32.mrb[0].mxu0 }
  0xe6   :  { %v3904_v54 = vadd.f32 %v3436_v53, %v146_v51  ;;  %v343_v56 = vpop.f32.mrb[1].mxu0 }
  0xe7   :  { %v3906_v57 = vadd.f32 %v343_v56, %v145_v52  ;;  %v3603_v52 = vpack.c.bf16 %v816_v48, %v815_v47  ;;  %v910_v56 = vld [vmem:[%s4796_s2 + $0xd0] sm:$0xff]  ;;  %v3275_v48 = vld [vmem:[%s4797_s3 + $0xc0] ss:$8 sm:$0x3] }
  0xe8   :  { %v367_v59 = vmax.f32 %v3904_v54, 0.0 }
  0xe9   :  { %v366_v60 = vmax.f32 %v3906_v57, 0.0  ;;  %v3439_v61 = vpop.f32.mrb[2].mxu0 }
  0xea   :  { %v375_v62 = vrot.slane %v367_v59, 4  ;;  %v3908_v63 = vadd.f32 %v3439_v61, %v148_v55  ;;  %v353_v0 = vpop.f32.mrb[3].mxu0  ;;  %v909_v55 = vld [vmem:[%s4796_s2 + $0xc8] sm:$0xff]  ;;  %v912_v61 = vld [vmem:[%s4796_s2 + $0xe0] sm:$0xff] }
  0xeb   :  { %v374_v3 = vrot.slane %v366_v60, 4  ;;  %v3910_v4 = vadd.f32 %v353_v0, %v147_v58  ;;  %v3607_v59 = vpack.c.bf16 %v910_v56, %v909_v55  ;;  %v911_v60 = vld [vmem:[%s4796_s2 + $0xd8] sm:$0xff] }
  0xec   :  { %v369_v5 = vmax.f32 %v3908_v63, 0.0  ;;  %v3611_v63 = vpack.c.bf16 %v912_v61, %v911_v60 }
  0xed   :  { %v376_v6 = vsel %vm259_vm3, %v374_v3, %v375_v62  ;;  %v368_v7 = vmax.f32 %v3910_v4, 0.0  ;;  %v383_v8 = vsel %vm259_vm3, 0.0, %v374_v3  ;;  %v3619_v3 = vpack.c.bf16 %v1013_v2, %v1011_v1  ;;  %v1010_v4 = vld [vmem:[%s4797_s3 + $0x20] sm:$0xff] }
  0xee   :  { %v379_v10 = vrot.slane %v369_v5, 4  ;;  %3448 = vmatprep.mubr.msk.f32.mxu1 %vm390_vm4, %v383_v8  ;;  %v498_v11 = vrot.slane %v383_v8, 4  ;;  %v499_v12 = vrot.slane %v376_v6, 4  ;;  %v1012_v5 = vld [vmem:[%s4797_s3 + $0x30] sm:$0xff]  ;;  %v1017_v8 = vld [vmem:[%s4797_s3 + $0x58] sm:$0xff] }
  0xef   :  { %v377_v15 = vrot.slane %v368_v7, 4  ;;  %3449 = vmatmul.mubr.msk.f32.vlgmr.msra.gmra.mrb[4].mxu1 %vm390_vm4, %v376_v6  ;;  %v1015_v7 = vld [vmem:[%s4797_s3 + $0x48] sm:$0xff] }
  0xf0   :  { %v384_v16 = vsel %vm259_vm3, %v379_v10, 0.0  ;;  %3578 = vmatpush3.bf16.msra.mxu1 %v3575_v42  ;;  %v500_v17 = vsel %vm259_vm3, %v498_v11, %v499_v12  ;;  %v3617_v42 = vpack.c.bf16 %v1008_v41, %v1006_v39  ;;  %v1016_v11 = vld [vmem:[%s4797_s3 + $0x50] sm:$0xff] }
  0xf1   :  { %v505_v18 = vrot.slane %v384_v16, 4  ;;  %v378_v19 = vsel %vm259_vm3, %v375_v62, %v377_v15  ;;  %3580 = vmatprep.subr.bf16.mxu1 %v3579_v9  ;;  %v380_v20 = vsel %vm259_vm3, %v377_v15, %v379_v10  ;;  %v1014_v10 = vld [vmem:[%s4797_s3 + $0x40] sm:$0xff]  ;;  %v4408_v15 = vpack.c.bf16 %v1021_v14, %v1019_v13 }
  0xf2   :  { %3451 = vmatprep.mubr.msk.f32.mxu1 %vm390_vm4, %v378_v19  ;;  %v501_v22 = vrot.slane %v378_v19, 4  ;;  %v503_v23 = vrot.slane %v380_v20, 4 }
  0xf3   :  { %3452 = vmatmul.mubr.msk.f32.gmra.mrb[6].mxu1 %vm390_vm4, %v380_v20 }
  0xf4   :  { %3582 = vmatpush3.bf16.msra.mxu1 %v3579_v9  ;;  %3462 = vmatprep.mubr.msk.f32.mxu1 %vm390_vm4, %v500_v17  ;;  %v502_v26 = vsel %vm259_vm3, %v499_v12, %v501_v22  ;;  %v504_v27 = vsel %vm259_vm3, %v501_v22, %v503_v23  ;;  %v506_v28 = vsel %vm259_vm3, %v503_v23, %v505_v18  ;;  %v1020_v17 = vld [vmem:[%s4797_s3 + $0x70] sm:$0xff]  ;;  %v1022_v22 = vld [vmem:[%s4797_s3 + $0x80] sm:$0xff] }
  0xf5   :  { %3584 = vmatprep.subr.bf16.mxu1 %v3583_v21  ;;  %v4389_v9 = vpack.c.bf16 %v1017_v8, %v1015_v7  ;;  %v4397_v12 = vpack.c.bf16 %v1016_v11, %v1014_v10  ;;  %v1024_v23 = vld [vmem:[%s4797_s3 + $0x90] sm:$0xff] }
  0xf6   :  { %v4434_v24 = vpack.c.bf16 %v1024_v23, %v1022_v22 }
  0xf7   :  { %3463 = vmatmul.mubr.msk.f32.vlgmr.msra.gmra.mrb[4].mxu1 %vm390_vm4, %v502_v26  ;;  %v1029_v26 = vld [vmem:[%s4797_s3 + $0xb8] sm:$0xff] }
  0xf8   :  { %3586 = vmatpush3.bf16.msra.mxu1 %v3583_v21  ;;  %3465 = vmatprep.mubr.msk.f32.mxu1 %vm390_vm4, %v504_v27  ;;  %v4444_v27 = vpack.c.bf16 %v1029_v26, %v1027_v25 }
  0xf9   :  { %3588 = vmatprep.subr.bf16.mxu1 %v3587_v29 }
  0xfb   :  { %3466 = vmatmul.mubr.msk.f32.gmra.mrb[6].mxu1 %vm390_vm4, %v506_v28  ;;  %v1026_v28 = vld [vmem:[%s4797_s3 + $0xa0] sm:$0xff] }
  0xfc   :  { %3590 = vmatpush3.bf16.msra.mxu1 %v3587_v29  ;;  %3476 = vmatprep.mubr.msk.f32.mxu1 %vm390_vm4, %v376_v6  ;;  %v3621_v6 = vpack.c.bf16 %v1012_v5, %v1010_v4  ;;  %v1028_v29 = vld [vmem:[%s4797_s3 + $0xb0] sm:$0xff] }
  0xfd   :  { %3616 = vmatprep.subr.bf16.mxu1 %v3615_v40  ;;  %v4452_v30 = vpack.c.bf16 %v1028_v29, %v1026_v28 }
  0xff   :  { %3477 = vmatmul.mubr.msk.f32.vlgmr.msra.gmra.mrb[4].mxu1 %vm390_vm4, %v378_v19  ;;  %v1023_v19 = vld [vmem:[%s4797_s3 + $0x88] sm:$0xff] }
 0x100   :  { %3479 = vmatprep.mubr.msk.f32.mxu1 %vm390_vm4, %v380_v20  ;;  %3618 = vmatpush1.bf16.msra.mxu1 %v3617_v42  ;;  %v1025_v20 = vld [vmem:[%s4797_s3 + $0x98] sm:$0xff] }
 0x101   :  { %3620 = vmatprep.subr.bf16.mxu1 %v3619_v3  ;;  %v4426_v21 = vpack.c.bf16 %v1025_v20, %v1023_v19 }
 0x103   :  { %3480 = vmatmul.mubr.msk.f32.gmra.mrb[6].mxu1 %vm390_vm4, %v384_v16  ;;  %v1018_v16 = vld [vmem:[%s4797_s3 + $0x60] sm:$0xff]  ;;  %s4161_s3 = smov 64  }
 0x104   :  { %1119 = vmatprep.mubr.f32.mxu1 %v4160_v36  ;;  %3622 = vmatpush1.bf16.msra.mxu1 %v3621_v6  ;;  %v4416_v18 = vpack.c.bf16 %v1020_v17, %v1018_v16 }
 0x105   :  { %3624 = vmatprep.subr.bf16.mxu1 %v4389_v9 }
 0x1d2   :  { %v3478_v44 = vpop.f32.mrb[4].mxu1 }
 0x1d3   :  { %v3911_v45 = vadd.f32 %v3478_v44, %v3255_v43  ;;  %v676_v46 = vpop.f32.mrb[5].mxu1 }
 0x1d4   :  { %v3912_v49 = vadd.f32 %v3255_v43, %v676_v46 }
 0x1d5   :  { %v700_v53 = vmax.f32 %v3911_v45, 0.0  ;;  %v1033_v45 = vlaneseq }
 0x1d6   :  { %v699_v50 = vmax.f32 %v3912_v49, 0.0  ;;  %v3481_v51 = vpop.f32.mrb[6].mxu1 }
 0x1d7   :  { %v686_v54 = vpop.f32.mrb[7].mxu1  ;;  %v3913_v62 = vadd.f32 %v3481_v51, %v3255_v43  ;;  %v1034_v46 = vshrl.u32 %v1033_v45, 7 }
 0x1d8   :  { %v3914_v57 = vadd.f32 %v3255_v43, %v686_v54  ;;  %3491 = vmatmul.mubr.msk.f32.vlgmr.msra.gmra.mrb[4].mxu0 %vm390_vm4, %v699_v50 }
 0x1d9   :  { %3602 = vmatpush3.bf16.msra.mxu0 %v3599_v35  ;;  %3493 = vmatprep.mubr.msk.f32.mxu0 %vm390_vm4, %v700_v53  ;;  %v702_v0 = vmax.f32 %v3913_v62, 0.0  ;;  %v1035_v47 = vsub.s32 0, %v1034_v46 }
 0x1da   :  { %v701_v58 = vmax.f32 %v3914_v57, 0.0  ;;  %3604 = vmatprep.subr.bf16.mxu0 %v3603_v52 }
 0x1dc   :  { %3494 = vmatmul.mubr.msk.f32.gmra.mrb[6].mxu0 %vm390_vm4, %v701_v58 }
 0x1dd   :  { %3606 = vmatpush3.bf16.msra.mxu0 %v3603_v52  ;;  %3504 = vmatprep.mubr.msk.f32.mxu0 %vm390_vm4, %v699_v50  ;;  %v1039_v50 = vsub.s32 1, %v1034_v46  ;;  %v1036_v52 = vrot.slane %v3275_v48, %v1035_v47 }
 0x1de   :  { %3608 = vmatprep.subr.bf16.mxu0 %v3607_v59 }
 0x1e0   :  { %3505 = vmatmul.mubr.msk.f32.vlgmr.msra.gmra.mrb[4].mxu0 %vm390_vm4, %v700_v53 }
 0x1e1   :  { %3610 = vmatpush3.bf16.msra.mxu0 %v3607_v59  ;;  %3507 = vmatprep.mubr.msk.f32.mxu0 %vm390_vm4, %v701_v58 }
 0x1e2   :  { %3612 = vmatprep.subr.bf16.mxu0 %v3611_v63 }
 0x1e4   :  { %3508 = vmatmul.mubr.msk.f32.gmra.mrb[6].mxu0 %vm390_vm4, %v702_v0 }
 0x1e5   :  { %3614 = vmatpush3.bf16.msra.mxu0 %v3611_v63  ;;  %3518 = vmatprep.mubr.msk.f32.mxu0 %vm390_vm4, %v700_v53  ;;  %v1040_v53 = vrot.slane %v3275_v48, %v1039_v50 }
 0x1e6   :  { %3640 = vmatprep.subr.bf16.mxu0 %v4389_v9 }
 0x1e8   :  { %3519 = vmatmul.mubr.msk.f32.vlgmr.msra.gmra.mrb[4].mxu0 %vm390_vm4, %v701_v58 }
 0x1e9   :  { %3521 = vmatprep.mubr.msk.f32.mxu0 %vm390_vm4, %v702_v0  ;;  %3642 = vmatpush1.bf16.msra.mxu0 %v4397_v12 }
 0x1ea   :  { %3644 = vmatprep.subr.bf16.mxu0 %v4408_v15 }
 0x1ec   :  { %3522 = vmatmul.mubr.f32.gmra.mrb[6].mxu0 %v4160_v36 }
 0x1ed   :  { %1317 = vmatprep.mubr.f32.mxu0 %v4160_v36  ;;  %3646 = vmatpush1.bf16.msra.mxu0 %v4416_v18 }
 0x1ee   :  { %3648 = vmatprep.subr.bf16.mxu0 %v4426_v21 }
 0x1f1   :  { %3650 = vmatpush1.bf16.msra.mxu0 %v4434_v24 }
 0x1f2   :  { %3652 = vmatprep.subr.bf16.mxu0 %v4444_v27 }
 0x1f5   :  { %3654 = vmatpush1.bf16.msra.mxu0 %v4452_v30 }
 0x1f6   :  { %3672 = vmatprep.subr.bf16.mxu0 %v4389_v9 }
 0x2bb   :  { %v3520_v32 = vpop.f32.mrb[4].mxu0 }
 0x2bc   :  { %v979_v33 = vpop.f32.mrb[5].mxu0  ;;  %v3915_v35 = vadd.f32 %v3520_v32, %v3267_v31 }
 0x2bd   :  { %v3916_v34 = vadd.f32 %v3267_v31, %v979_v33 }
 0x2be   :  { %v1003_v40 = vmax.f32 %v3915_v35, 0.0 }
 0x2bf   :  { %v1002_v37 = vmax.f32 %v3916_v34, 0.0  ;;  %v3523_v38 = vpop.f32.mrb[6].mxu0 }
 0x2c0   :  { %v989_v39 = vpop.f32.mrb[7].mxu0  ;;  %v3917_v42 = vadd.f32 %v3523_v38, %v3267_v31 }
 0x2c1   :  { %3276 = vmatmul.mubr.msk.f32.vlgmr.msra.gmra.mrb[8].mxu1 %vm390_vm4, %v1002_v37  ;;  %v3918_v41 = vadd.f32 %v3267_v31, %v989_v39 }
 0x2c2   :  { %3626 = vmatpush1.bf16.msra.mxu1 %v4397_v12  ;;  %1125 = vmatprep.mubr.f32.mxu1 %v4160_v36  ;;  %v1005_v44 = vmax.f32 %v3917_v42, 0.0 }
 0x2c3   :  { %3628 = vmatprep.subr.bf16.mxu1 %v4408_v15  ;;  %v1004_v43 = vmax.f32 %v3918_v41, 0.0 }
 0x2c5   :  { %3277 = vmatmul.mubr.msk.f32.gmra.mrb[10].mxu1 %vm390_vm4, %v1003_v40 }
 0x2c6   :  { %3630 = vmatpush1.bf16.msra.mxu1 %v4416_v18  ;;  %1131 = vmatprep.mubr.f32.mxu1 %v4160_v36 }
 0x2c7   :  { %3632 = vmatprep.subr.bf16.mxu1 %v4426_v21 }
 0x2c9   :  { %3278 = vmatmul.mubr.msk.f32.gmra.mrb[12].mxu1 %vm390_vm4, %v1004_v43 }
 0x2ca   :  { %3634 = vmatpush1.bf16.msra.mxu1 %v4434_v24  ;;  %1137 = vmatprep.mubr.f32.mxu1 %v4160_v36 }
 0x2cb   :  { %3636 = vmatprep.subr.bf16.mxu1 %v4444_v27 }
 0x2cd   :  { %3279 = vmatmul.mubr.msk.f32.gmra.mrb[14].mxu1 %vm390_vm4, %v1005_v44 }
 0x2ce   :  { %3638 = vmatpush1.bf16.msra.mxu1 %v4452_v30  ;;  %1211 = vmatprep.mubr.f32.mxu1 %v4160_v36 }
 0x2cf   :  { %3656 = vmatprep.subr.bf16.mxu1 %v4389_v9 }
 0x2d1   :  { %1212 = vmatmul.mubr.f32.vlgmr.msra.gmra.mrb[16].mxu1 %v4160_v36 }
 0x2d2   :  { %3658 = vmatpush1.bf16.msra.mxu1 %v4397_v12  ;;  %1433 = vmatprep.mubr.f32.mxu1 %v4160_v36 }
 0x2d3   :  { %3660 = vmatprep.subr.bf16.mxu1 %v4408_v15 }
 0x2d6   :  { %3662 = vmatpush1.bf16.msra.mxu1 %v4416_v18 }
 0x2d7   :  { %3664 = vmatprep.subr.bf16.mxu1 %v4426_v21 }
 0x2da   :  { %3666 = vmatpush1.bf16.msra.mxu1 %v4434_v24 }
 0x2db   :  { %3668 = vmatprep.subr.bf16.mxu1 %v4444_v27 }
 0x2de   :  { %3670 = vmatpush1.bf16.msra.mxu1 %v4452_v30 }
 0x2df   :  { %3688 = vmatprep.subr.bf16.mxu1 %v4389_v9 }
 0x394   :  { %v1121_v49 = vpop.f32.mrb[8].mxu1 }
 0x395   :  { %v1123_v51 = vpop.f32.mrb[9].mxu1  ;;  %v4505_v7 = vadd.f32 %v1121_v49, %v1036_v52 }
 0x396   :  { %v4501_v2 = vadd.f32 %v1123_v51, %v1040_v53 }
 0x398   :  { %v1127_v54 = vpop.f32.mrb[10].mxu1 }
 0x399   :  { %v4489_v55 = vadd.f32 %v1127_v54, %v1036_v52  ;;  %v1129_v56 = vpop.f32.mrb[11].mxu1 }
 0x39a   :  { %v4491_v57 = vadd.f32 %v1129_v56, %v1040_v53 }
 0x39c   :  { %v1133_v58 = vpop.f32.mrb[12].mxu1 }
 0x39d   :  { %v4493_v59 = vadd.f32 %v1133_v58, %v1036_v52  ;;  %v1135_v60 = vpop.f32.mrb[13].mxu1 }
 0x39e   :  { %v4495_v61 = vadd.f32 %v1135_v60, %v1040_v53 }
 0x3a0   :  { %v1139_v62 = vpop.f32.mrb[14].mxu1 }
 0x3a1   :  { %v4497_v63 = vadd.f32 %v1139_v62, %v1036_v52  ;;  %v1141_v0 = vpop.f32.mrb[15].mxu1 }
 0x3a2   :  { %v4499_v1 = vadd.f32 %v1141_v0, %v1040_v53 }
 0x3a4   :  { %v1213_v3 = vpop.f32.mrb[16].mxu1 }
 0x3a5   :  { %v1215_v4 = vpop.f32.mrb[17].mxu1  ;;  %v1218_v8 = vadd.f32 %v1213_v3, %v4505_v7 }
 0x3a6   :  { %v1219_v5 = vadd.f32 %v1215_v4, %v4501_v2 }
 0x3a7   :  { %v3280_v10 = vmul.f32 -1.442695, %v1218_v8 }
 0x3a8   :  { %3944 = vtanh.f32 %v1219_v5  ;;  %v3281_v25 = vmul.f32 -1.442695, %v1219_v5 }
 0x3a9   :  { %3946 = vpow2.f32 %v3280_v10 }
 0x3b2   :  { %v3945_v6 = vpop.eup %3944 }
 0x3b3   :  { %1235 = vrot.lane.b32.xlu0 %v3945_v6, %s4161_s3  ;;  %v3947_v11 = vpop.eup %3946 }
 0x3b4   :  { %v1226_v13 = vadd.f32 1.0, %v3947_v11 }
 0x3b6   :  { %3948 = vrcp.f32 %v1226_v13 }
 0x3c0   :  { %v3949_v14 = vpop.eup %3948 }
 0x3c1   :  { %v1233_v19 = vmul.f32 0.0, %v3949_v14 }
 0x425   :  { %v1236_v16 = vpop.permute.xlu0 %1235 }
 0x426   :  { %v1238_v17 = vmul.f32 %v3949_v14, %v1236_v16 }
 0x428   :  { %1240 = vrot.lane.b32.xlu0 %v1238_v17, %s4161_s3 }
 0x49a   :  { %v1241_v20 = vpop.permute.xlu0 %1240 }
 0x49b   :  { %v1243_v22 = vadd.f32 %v1241_v20, %v1233_v19 }
 0x49d   :  { %3950 = vtanh.f32 %v1243_v22  ;;  %v1346_v47 = vrot.slane %v1243_v22, 6 }
 0x49e   :  { %3952 = vpow2.f32 %v3281_v25 }
 0x4a7   :  { %v3951_v23 = vpop.eup %3950 }
 0x4a8   :  { %1246 = vrot.lane.b32.xlu1 %v3951_v23, %s4161_s3  ;;  %v3953_v26 = vpop.eup %3952 }
 0x4a9   :  { %v1227_v28 = vadd.f32 1.0, %v3953_v26 }
 0x4ab   :  { %3954 = vrcp.f32 %v1227_v28 }
 0x4b5   :  { %v3955_v29 = vpop.eup %3954 }
 0x51a   :  { %v1247_v31 = vpop.permute.xlu1 %1246 }
 0x51b   :  { %v1249_v32 = vmul.f32 %v3955_v29, %v1247_v31 }
 0x51d   :  { %3282 = vmatmul.mubr.msk.f32.vlgmr.msra.gmra.mrb[8].mxu0 %vm1144_vm5, %v1249_v32 }
 0x51e   :  { %3674 = vmatpush1.bf16.msra.mxu0 %v4397_v12  ;;  %1549 = vmatprep.mubr.f32.mxu0 %v4160_v36 }
 0x51f   :  { %3676 = vmatprep.subr.bf16.mxu0 %v4408_v15 }
 0x522   :  { %3678 = vmatpush1.bf16.msra.mxu0 %v4416_v18 }
 0x523   :  { %3680 = vmatprep.subr.bf16.mxu0 %v4426_v21 }
 0x526   :  { %3682 = vmatpush1.bf16.msra.mxu0 %v4434_v24 }
 0x527   :  { %3684 = vmatprep.subr.bf16.mxu0 %v4444_v27 }
 0x52a   :  { %3686 = vmatpush1.bf16.msra.mxu0 %v4452_v30 }
 0x52b   :  { %3704 = vmatprep.subr.bf16.mxu0 %v4389_v9 }
 0x5f0   :  { %v1319_v33 = vpop.f32.mrb[8].mxu0 }
 0x5f1   :  { %v1321_v34 = vpop.f32.mrb[9].mxu0  ;;  %v1326_v39 = vrot.slane %v1319_v33, 6 }
 0x5f2   :  { %v1327_v35 = vrot.slane %v1321_v34, 6 }
 0x5f3   :  { %v1330_v40 = vadd.f32 %v1326_v39, %v4505_v7 }
 0x5f4   :  { %v1331_v37 = vadd.f32 %v1327_v35, %v4501_v2 }
 0x5f5   :  { %v3283_v41 = vmul.f32 -1.442695, %v1330_v40 }
 0x5f6   :  { %3956 = vtanh.f32 %v1331_v37  ;;  %v3284_v52 = vmul.f32 -1.442695, %v1331_v37 }
 0x5f7   :  { %3958 = vpow2.f32 %v3283_v41 }
 0x600   :  { %v3957_v38 = vpop.eup %3956 }
 0x601   :  { %1350 = vrot.lane.b32.xlu1 %v3957_v38, %s4161_s3  ;;  %v3959_v42 = vpop.eup %3958 }
 0x602   :  { %v1338_v43 = vadd.f32 1.0, %v3959_v42 }
 0x604   :  { %3960 = vrcp.f32 %v1338_v43 }
 0x60e   :  { %v3961_v44 = vpop.eup %3960 }
 0x60f   :  { %v1348_v48 = vmul.f32 %v3961_v44, %v1346_v47 }
 0x673   :  { %v1351_v45 = vpop.permute.xlu1 %1350 }
 0x674   :  { %v1353_v46 = vmul.f32 %v3961_v44, %v1351_v45 }
 0x676   :  { %1355 = vrot.lane.b32.xlu0 %v1353_v46, %s4161_s3 }
 0x6e8   :  { %v1356_v49 = vpop.permute.xlu0 %1355 }
 0x6e9   :  { %v1358_v50 = vadd.f32 %v1356_v49, %v1348_v48 }
 0x6eb   :  { %3962 = vtanh.f32 %v1358_v50  ;;  %v1462_v20 = vrot.slane %v1358_v50, 6 }
 0x6ec   :  { %3964 = vpow2.f32 %v3284_v52 }
 0x6f5   :  { %v3963_v51 = vpop.eup %3962 }
 0x6f6   :  { %1361 = vrot.lane.b32.xlu1 %v3963_v51, %s4161_s3  ;;  %v3965_v53 = vpop.eup %3964 }
 0x6f7   :  { %v1339_v54 = vadd.f32 1.0, %v3965_v53 }
 0x6f9   :  { %3966 = vrcp.f32 %v1339_v54 }
 0x703   :  { %v3967_v56 = vpop.eup %3966 }
 0x768   :  { %v1362_v58 = vpop.permute.xlu1 %1361 }
 0x769   :  { %v1364_v60 = vmul.f32 %v3967_v56, %v1362_v58 }
 0x76b   :  { %v1366_v62 = vrot.slane %v1364_v60, 2 }
 0x76d   :  { %3285 = vmatmul.mubr.msk.f32.vlgmr.msra.gmra.mrb[18].mxu1 %vm1144_vm5, %v1366_v62 }
 0x76e   :  { %3690 = vmatpush1.bf16.msra.mxu1 %v4397_v12  ;;  %1665 = vmatprep.mubr.f32.mxu1 %v4160_v36 }
 0x76f   :  { %3692 = vmatprep.subr.bf16.mxu1 %v4408_v15 }
 0x772   :  { %3694 = vmatpush1.bf16.msra.mxu1 %v4416_v18 }
 0x773   :  { %3696 = vmatprep.subr.bf16.mxu1 %v4426_v21 }
 0x776   :  { %3698 = vmatpush1.bf16.msra.mxu1 %v4434_v24 }
 0x777   :  { %3700 = vmatprep.subr.bf16.mxu1 %v4444_v27 }
 0x77a   :  { %3702 = vmatpush1.bf16.msra.mxu1 %v4452_v30 }
 0x77b   :  { %3720 = vmatprep.subr.bf16.mxu1 %v4389_v9 }
 0x840   :  { %v1435_v0 = vpop.f32.mrb[18].mxu1 }
 0x841   :  { %v1437_v3 = vpop.f32.mrb[19].mxu1  ;;  %v1442_v8 = vrot.slane %v1435_v0, 4 }
 0x842   :  { %v1443_v4 = vrot.slane %v1437_v3, 4 }
 0x843   :  { %v1446_v10 = vadd.f32 %v1442_v8, %v4505_v7 }
 0x844   :  { %v1447_v5 = vadd.f32 %v1443_v4, %v4501_v2 }
 0x845   :  { %v3286_v11 = vmul.f32 -1.442695, %v1446_v10 }
 0x846   :  { %3968 = vtanh.f32 %v1447_v5  ;;  %v3287_v28 = vmul.f32 -1.442695, %v1447_v5 }
 0x847   :  { %3970 = vpow2.f32 %v3286_v11 }
 0x850   :  { %v3969_v6 = vpop.eup %3968 }
 0x851   :  { %1466 = vrot.lane.b32.xlu0 %v3969_v6, %s4161_s3  ;;  %v3971_v13 = vpop.eup %3970 }
 0x852   :  { %v1454_v14 = vadd.f32 1.0, %v3971_v13 }
 0x854   :  { %3972 = vrcp.f32 %v1454_v14 }
 0x85e   :  { %v3973_v16 = vpop.eup %3972 }
 0x85f   :  { %v1464_v22 = vmul.f32 %v3973_v16, %v1462_v20 }
 0x8c3   :  { %v1467_v17 = vpop.permute.xlu0 %1466 }
 0x8c4   :  { %v1469_v19 = vmul.f32 %v3973_v16, %v1467_v17 }
 0x8c6   :  { %1471 = vrot.lane.b32.xlu1 %v1469_v19, %s4161_s3 }
 0x938   :  { %v1472_v23 = vpop.permute.xlu1 %1471 }
 0x939   :  { %v1474_v25 = vadd.f32 %v1472_v23, %v1464_v22 }
 0x93b   :  { %3974 = vtanh.f32 %v1474_v25  ;;  %v1578_v50 = vrot.slane %v1474_v25, 6 }
 0x93c   :  { %3976 = vpow2.f32 %v3287_v28 }
 0x945   :  { %v3975_v26 = vpop.eup %3974 }
 0x946   :  { %1477 = vrot.lane.b32.xlu0 %v3975_v26, %s4161_s3  ;;  %v3977_v29 = vpop.eup %3976 }
 0x947   :  { %v1455_v31 = vadd.f32 1.0, %v3977_v29 }
 0x949   :  { %3978 = vrcp.f32 %v1455_v31 }
 0x953   :  { %v3979_v32 = vpop.eup %3978 }
 0x9b8   :  { %v1478_v33 = vpop.permute.xlu0 %1477 }
 0x9b9   :  { %v1480_v34 = vmul.f32 %v3979_v32, %v1478_v33 }
 0x9bb   :  { %v1482_v35 = vrot.slane %v1480_v34, 4 }
 0x9bd   :  { %3288 = vmatmul.mubr.msk.f32.vlgmr.msra.gmra.mrb[10].mxu0 %vm1144_vm5, %v1482_v35 }
 0x9be   :  { %3706 = vmatpush1.bf16.msra.mxu0 %v4397_v12  ;;  %1774 = vmatprep.mubr.f32.mxu0 %v4160_v36 }
 0x9bf   :  { %3708 = vmatprep.subr.bf16.mxu0 %v4408_v15 }
 0x9c2   :  { %3710 = vmatpush1.bf16.msra.mxu0 %v4416_v18 }
 0x9c3   :  { %3712 = vmatprep.subr.bf16.mxu0 %v4426_v21 }
 0x9c6   :  { %3714 = vmatpush1.bf16.msra.mxu0 %v4434_v24 }
 0x9c7   :  { %3716 = vmatprep.subr.bf16.mxu0 %v4444_v27 }
 0x9ca   :  { %3718 = vmatpush1.bf16.msra.mxu0 %v4452_v30 }
 0x9cb   :  { %3736 = vmatprep.subr.bf16.mxu0 %v4389_v9 }
 0xa90   :  { %v1551_v37 = vpop.f32.mrb[10].mxu0 }
 0xa91   :  { %v1553_v38 = vpop.f32.mrb[11].mxu0  ;;  %v1558_v42 = vrot.slane %v1551_v37, 2 }
 0xa92   :  { %v1559_v39 = vrot.slane %v1553_v38, 2 }
 0xa93   :  { %v1562_v43 = vadd.f32 %v1558_v42, %v4505_v7 }
 0xa94   :  { %v1563_v40 = vadd.f32 %v1559_v39, %v4501_v2 }
 0xa95   :  { %v3289_v44 = vmul.f32 -1.442695, %v1562_v43 }
 0xa96   :  { %3980 = vtanh.f32 %v1563_v40  ;;  %v3290_v54 = vmul.f32 -1.442695, %v1563_v40 }
 0xa97   :  { %3982 = vpow2.f32 %v3289_v44 }
 0xaa0   :  { %v3981_v41 = vpop.eup %3980 }
 0xaa1   :  { %1582 = vrot.lane.b32.xlu1 %v3981_v41, %s4161_s3  ;;  %v3983_v45 = vpop.eup %3982 }
 0xaa2   :  { %v1570_v46 = vadd.f32 1.0, %v3983_v45 }
 0xaa4   :  { %3984 = vrcp.f32 %v1570_v46 }
 0xaae   :  { %v3985_v47 = vpop.eup %3984 }
 0xaaf   :  { %v1580_v51 = vmul.f32 %v3985_v47, %v1578_v50 }
 0xb13   :  { %v1583_v48 = vpop.permute.xlu1 %1582 }
 0xb14   :  { %v1585_v49 = vmul.f32 %v3985_v47, %v1583_v48 }
 0xb16   :  { %1587 = vrot.lane.b32.xlu0 %v1585_v49, %s4161_s3 }
 0xb88   :  { %v1588_v2 = vpop.permute.xlu0 %1587 }
 0xb89   :  { %v1590_v52 = vadd.f32 %v1588_v2, %v1580_v51 }
 0xb8b   :  { %3986 = vtanh.f32 %v1590_v52  ;;  %v1688_v19 = vrot.slane %v1590_v52, 6 }
 0xb8c   :  { %3988 = vpow2.f32 %v3290_v54 }
 0xb95   :  { %v3987_v53 = vpop.eup %3986 }
 0xb96   :  { %1593 = vrot.lane.b32.xlu1 %v3987_v53, %s4161_s3  ;;  %v3989_v7 = vpop.eup %3988 }
 0xb97   :  { %v1571_v56 = vadd.f32 1.0, %v3989_v7 }
 0xb99   :  { %3990 = vrcp.f32 %v1571_v56 }
 0xba3   :  { %v3991_v58 = vpop.eup %3990 }
 0xc08   :  { %v1594_v60 = vpop.permute.xlu1 %1593 }
 0xc09   :  { %v1596_v62 = vmul.f32 %v3991_v58, %v1594_v60 }
 0xc0b   :  { %v1598_v0 = vrot.slane %v1596_v62, 6 }
 0xc0d   :  { %3291 = vmatmul.mubr.msk.f32.vlgmr.msra.gmra.mrb[20].mxu1 %vm1144_vm5, %v1598_v0 }
 0xc0e   :  { %3722 = vmatpush1.bf16.msra.mxu1 %v4397_v12  ;;  %1890 = vmatprep.mubr.f32.mxu1 %v4160_v36 }
 0xc0f   :  { %3724 = vmatprep.subr.bf16.mxu1 %v4408_v15 }
 0xc12   :  { %3726 = vmatpush1.bf16.msra.mxu1 %v4416_v18 }
 0xc13   :  { %3728 = vmatprep.subr.bf16.mxu1 %v4426_v21 }
 0xc16   :  { %3730 = vmatpush1.bf16.msra.mxu1 %v4434_v24 }
 0xc17   :  { %3732 = vmatprep.subr.bf16.mxu1 %v4444_v27 }
 0xc1a   :  { %3734 = vmatpush1.bf16.msra.mxu1 %v4452_v30 }
 0xc1b   :  { %3752 = vmatprep.subr.bf16.mxu1 %v4389_v9 }
 0xce0   :  { %v1667_v3 = vpop.f32.mrb[20].mxu1 }
 0xce1   :  { %v1669_v4 = vpop.f32.mrb[21].mxu1  ;;  %v1672_v8 = vadd.f32 %v1667_v3, %v4489_v55 }
 0xce2   :  { %v1673_v5 = vadd.f32 %v1669_v4, %v4491_v57 }
 0xce3   :  { %v3292_v10 = vmul.f32 -1.442695, %v1672_v8 }
 0xce4   :  { %3992 = vtanh.f32 %v1673_v5  ;;  %v3293_v26 = vmul.f32 -1.442695, %v1673_v5 }
 0xce5   :  { %3994 = vpow2.f32 %v3292_v10 }
 0xcee   :  { %v3993_v6 = vpop.eup %3992 }
 0xcef   :  { %1692 = vrot.lane.b32.xlu0 %v3993_v6, %s4161_s3  ;;  %v3995_v11 = vpop.eup %3994 }
 0xcf0   :  { %v1680_v13 = vadd.f32 1.0, %v3995_v11 }
 0xcf2   :  { %3996 = vrcp.f32 %v1680_v13 }
 0xcfc   :  { %v3997_v14 = vpop.eup %3996 }
 0xcfd   :  { %v1690_v20 = vmul.f32 %v3997_v14, %v1688_v19 }
 0xd61   :  { %v1693_v16 = vpop.permute.xlu0 %1692 }
 0xd62   :  { %v1695_v17 = vmul.f32 %v3997_v14, %v1693_v16 }
 0xd64   :  { %1697 = vrot.lane.b32.xlu1 %v1695_v17, %s4161_s3 }
 0xdd6   :  { %v1698_v22 = vpop.permute.xlu1 %1697 }
 0xdd7   :  { %v1700_v23 = vadd.f32 %v1698_v22, %v1690_v20 }
 0xdd9   :  { %3998 = vtanh.f32 %v1700_v23  ;;  %v1803_v48 = vrot.slane %v1700_v23, 6 }
 0xdda   :  { %4000 = vpow2.f32 %v3293_v26 }
 0xde3   :  { %v3999_v25 = vpop.eup %3998 }
 0xde4   :  { %1703 = vrot.lane.b32.xlu0 %v3999_v25, %s4161_s3  ;;  %v4001_v28 = vpop.eup %4000 }
 0xde5   :  { %v1681_v29 = vadd.f32 1.0, %v4001_v28 }
 0xde7   :  { %4002 = vrcp.f32 %v1681_v29 }
 0xdf1   :  { %v4003_v31 = vpop.eup %4002 }
 0xe56   :  { %v1704_v32 = vpop.permute.xlu0 %1703 }
 0xe57   :  { %v1706_v33 = vmul.f32 %v4003_v31, %v1704_v32 }
 0xe59   :  { %3294 = vmatmul.mubr.msk.f32.vlgmr.msra.gmra.mrb[12].mxu0 %vm1144_vm5, %v1706_v33 }
 0xe5a   :  { %3738 = vmatpush1.bf16.msra.mxu0 %v4397_v12  ;;  %2006 = vmatprep.mubr.f32.mxu0 %v4160_v36 }
 0xe5b   :  { %3740 = vmatprep.subr.bf16.mxu0 %v4408_v15 }
 0xe5e   :  { %3742 = vmatpush1.bf16.msra.mxu0 %v4416_v18 }
 0xe5f   :  { %3744 = vmatprep.subr.bf16.mxu0 %v4426_v21 }
 0xe62   :  { %3746 = vmatpush1.bf16.msra.mxu0 %v4434_v24 }
 0xe63   :  { %3748 = vmatprep.subr.bf16.mxu0 %v4444_v27 }
 0xe66   :  { %3750 = vmatpush1.bf16.msra.mxu0 %v4452_v30 }
 0xe67   :  { %3768 = vmatprep.subr.bf16.mxu0 %v4389_v9 }
 0xf2c   :  { %v1776_v34 = vpop.f32.mrb[12].mxu0 }
 0xf2d   :  { %v1778_v35 = vpop.f32.mrb[13].mxu0  ;;  %v1783_v40 = vrot.slane %v1776_v34, 6 }
 0xf2e   :  { %v1784_v37 = vrot.slane %v1778_v35, 6 }
 0xf2f   :  { %v1787_v41 = vadd.f32 %v1783_v40, %v4489_v55 }
 0xf30   :  { %v1788_v38 = vadd.f32 %v1784_v37, %v4491_v57 }
 0xf31   :  { %v3295_v42 = vmul.f32 -1.442695, %v1787_v41 }
 0xf32   :  { %4004 = vtanh.f32 %v1788_v38  ;;  %v3296_v52 = vmul.f32 -1.442695, %v1788_v38 }
 0xf33   :  { %4006 = vpow2.f32 %v3295_v42 }
 0xf3c   :  { %v4005_v39 = vpop.eup %4004 }
 0xf3d   :  { %1807 = vrot.lane.b32.xlu1 %v4005_v39, %s4161_s3  ;;  %v4007_v43 = vpop.eup %4006 }
 0xf3e   :  { %v1795_v44 = vadd.f32 1.0, %v4007_v43 }
 0xf40   :  { %4008 = vrcp.f32 %v1795_v44 }
 0xf4a   :  { %v4009_v45 = vpop.eup %4008 }
 0xf4b   :  { %v1805_v49 = vmul.f32 %v4009_v45, %v1803_v48 }
 0xfaf   :  { %v1808_v46 = vpop.permute.xlu1 %1807 }
 0xfb0   :  { %v1810_v47 = vmul.f32 %v4009_v45, %v1808_v46 }
 0xfb2   :  { %1812 = vrot.lane.b32.xlu0 %v1810_v47, %s4161_s3 }
0x1024   :  { %v1813_v50 = vpop.permute.xlu0 %1812 }
0x1025   :  { %v1815_v51 = vadd.f32 %v1813_v50, %v1805_v49 }
0x1027   :  { %4010 = vtanh.f32 %v1815_v51  ;;  %v1919_v19 = vrot.slane %v1815_v51, 6 }
0x1028   :  { %4012 = vpow2.f32 %v3296_v52 }
0x1031   :  { %v4011_v2 = vpop.eup %4010 }
0x1032   :  { %1818 = vrot.lane.b32.xlu1 %v4011_v2, %s4161_s3  ;;  %v4013_v53 = vpop.eup %4012 }
0x1033   :  { %v1796_v54 = vadd.f32 1.0, %v4013_v53 }
0x1035   :  { %4014 = vrcp.f32 %v1796_v54 }
0x103f   :  { %v4015_v7 = vpop.eup %4014 }
0x10a4   :  { %v1819_v56 = vpop.permute.xlu1 %1818 }
0x10a5   :  { %v1821_v58 = vmul.f32 %v4015_v7, %v1819_v56 }
0x10a7   :  { %v1823_v60 = vrot.slane %v1821_v58, 2 }
0x10a9   :  { %3297 = vmatmul.mubr.msk.f32.vlgmr.msra.gmra.mrb[22].mxu1 %vm1144_vm5, %v1823_v60 }
0x10aa   :  { %3754 = vmatpush1.bf16.msra.mxu1 %v4397_v12  ;;  %2122 = vmatprep.mubr.f32.mxu1 %v4160_v36 }
0x10ab   :  { %3756 = vmatprep.subr.bf16.mxu1 %v4408_v15 }
0x10ae   :  { %3758 = vmatpush1.bf16.msra.mxu1 %v4416_v18 }
0x10af   :  { %3760 = vmatprep.subr.bf16.mxu1 %v4426_v21 }
0x10b2   :  { %3762 = vmatpush1.bf16.msra.mxu1 %v4434_v24 }
0x10b3   :  { %3764 = vmatprep.subr.bf16.mxu1 %v4444_v27 }
0x10b6   :  { %3766 = vmatpush1.bf16.msra.mxu1 %v4452_v30 }
0x10b7   :  { %3784 = vmatprep.subr.bf16.mxu1 %v4389_v9 }
0x117c   :  { %v1892_v62 = vpop.f32.mrb[22].mxu1 }
0x117d   :  { %v1894_v0 = vpop.f32.mrb[23].mxu1  ;;  %v1899_v6 = vrot.slane %v1892_v62, 4 }
0x117e   :  { %v1900_v3 = vrot.slane %v1894_v0, 4 }
0x117f   :  { %v1903_v8 = vadd.f32 %v1899_v6, %v4489_v55 }
0x1180   :  { %v1904_v4 = vadd.f32 %v1900_v3, %v4491_v57 }
0x1181   :  { %v3298_v10 = vmul.f32 -1.442695, %v1903_v8 }
0x1182   :  { %4016 = vtanh.f32 %v1904_v4  ;;  %v3299_v26 = vmul.f32 -1.442695, %v1904_v4 }
0x1183   :  { %4018 = vpow2.f32 %v3298_v10 }
0x118c   :  { %v4017_v5 = vpop.eup %4016 }
0x118d   :  { %1923 = vrot.lane.b32.xlu0 %v4017_v5, %s4161_s3  ;;  %v4019_v11 = vpop.eup %4018 }
0x118e   :  { %v1911_v13 = vadd.f32 1.0, %v4019_v11 }
0x1190   :  { %4020 = vrcp.f32 %v1911_v13 }
0x119a   :  { %v4021_v14 = vpop.eup %4020 }
0x119b   :  { %v1921_v20 = vmul.f32 %v4021_v14, %v1919_v19 }
0x11ff   :  { %v1924_v16 = vpop.permute.xlu0 %1923 }
0x1200   :  { %v1926_v17 = vmul.f32 %v4021_v14, %v1924_v16 }
0x1202   :  { %1928 = vrot.lane.b32.xlu1 %v1926_v17, %s4161_s3 }
0x1274   :  { %v1929_v22 = vpop.permute.xlu1 %1928 }
0x1275   :  { %v1931_v23 = vadd.f32 %v1929_v22, %v1921_v20 }
0x1277   :  { %4022 = vtanh.f32 %v1931_v23  ;;  %v2035_v49 = vrot.slane %v1931_v23, 6 }
0x1278   :  { %4024 = vpow2.f32 %v3299_v26 }
0x1281   :  { %v4023_v25 = vpop.eup %4022 }
0x1282   :  { %1934 = vrot.lane.b32.xlu0 %v4023_v25, %s4161_s3  ;;  %v4025_v28 = vpop.eup %4024 }
0x1283   :  { %v1912_v29 = vadd.f32 1.0, %v4025_v28 }
0x1285   :  { %4026 = vrcp.f32 %v1912_v29 }
0x128f   :  { %v4027_v31 = vpop.eup %4026 }
0x12f4   :  { %v1935_v32 = vpop.permute.xlu0 %1934 }
0x12f5   :  { %v1937_v33 = vmul.f32 %v4027_v31, %v1935_v32 }
0x12f7   :  { %v1939_v34 = vrot.slane %v1937_v33, 4 }
0x12f9   :  { %3300 = vmatmul.mubr.msk.f32.vlgmr.msra.gmra.mrb[14].mxu0 %vm1144_vm5, %v1939_v34 }
0x12fa   :  { %3770 = vmatpush1.bf16.msra.mxu0 %v4397_v12  ;;  %2231 = vmatprep.mubr.f32.mxu0 %v4160_v36 }
0x12fb   :  { %3772 = vmatprep.subr.bf16.mxu0 %v4408_v15 }
0x12fe   :  { %3774 = vmatpush1.bf16.msra.mxu0 %v4416_v18 }
0x12ff   :  { %3776 = vmatprep.subr.bf16.mxu0 %v4426_v21 }
0x1302   :  { %3778 = vmatpush1.bf16.msra.mxu0 %v4434_v24 }
0x1303   :  { %3780 = vmatprep.subr.bf16.mxu0 %v4444_v27 }
0x1306   :  { %3782 = vmatpush1.bf16.msra.mxu0 %v4452_v30 }
0x1307   :  { %3800 = vmatprep.subr.bf16.mxu0 %v4389_v9 }
0x13cc   :  { %v2008_v35 = vpop.f32.mrb[14].mxu0 }
0x13cd   :  { %v2010_v37 = vpop.f32.mrb[15].mxu0  ;;  %v2015_v41 = vrot.slane %v2008_v35, 2 }
0x13ce   :  { %v2016_v38 = vrot.slane %v2010_v37, 2 }
0x13cf   :  { %v2019_v42 = vadd.f32 %v2015_v41, %v4489_v55 }
0x13d0   :  { %v2020_v39 = vadd.f32 %v2016_v38, %v4491_v57 }
0x13d1   :  { %v3301_v43 = vmul.f32 -1.442695, %v2019_v42 }
0x13d2   :  { %4028 = vtanh.f32 %v2020_v39  ;;  %v3302_v52 = vmul.f32 -1.442695, %v2020_v39 }
0x13d3   :  { %4030 = vpow2.f32 %v3301_v43 }
0x13dc   :  { %v4029_v40 = vpop.eup %4028 }
0x13dd   :  { %2039 = vrot.lane.b32.xlu1 %v4029_v40, %s4161_s3  ;;  %v4031_v44 = vpop.eup %4030 }
0x13de   :  { %v2027_v45 = vadd.f32 1.0, %v4031_v44 }
0x13e0   :  { %4032 = vrcp.f32 %v2027_v45 }
0x13ea   :  { %v4033_v46 = vpop.eup %4032 }
0x13eb   :  { %v2037_v50 = vmul.f32 %v4033_v46, %v2035_v49 }
0x144f   :  { %v2040_v47 = vpop.permute.xlu1 %2039 }
0x1450   :  { %v2042_v48 = vmul.f32 %v4033_v46, %v2040_v47 }
0x1452   :  { %2044 = vrot.lane.b32.xlu0 %v2042_v48, %s4161_s3 }
0x14c4   :  { %v2045_v57 = vpop.permute.xlu0 %2044 }
0x14c5   :  { %v2047_v51 = vadd.f32 %v2045_v57, %v2037_v50 }
0x14c7   :  { %4034 = vtanh.f32 %v2047_v51  ;;  %v2145_v14 = vrot.slane %v2047_v51, 6 }
0x14c8   :  { %4036 = vpow2.f32 %v3302_v52 }
0x14d1   :  { %v4035_v2 = vpop.eup %4034 }
0x14d2   :  { %2050 = vrot.lane.b32.xlu1 %v4035_v2, %s4161_s3  ;;  %v4037_v55 = vpop.eup %4036 }
0x14d3   :  { %v2028_v53 = vadd.f32 1.0, %v4037_v55 }
0x14d5   :  { %4038 = vrcp.f32 %v2028_v53 }
0x14df   :  { %v4039_v54 = vpop.eup %4038 }
0x1544   :  { %v2051_v7 = vpop.permute.xlu1 %2050 }
0x1545   :  { %v2053_v56 = vmul.f32 %v4039_v54, %v2051_v7 }
0x1547   :  { %v2055_v58 = vrot.slane %v2053_v56, 6 }
0x1549   :  { %3303 = vmatmul.mubr.msk.f32.vlgmr.msra.gmra.mrb[24].mxu1 %vm1144_vm5, %v2055_v58 }
0x154a   :  { %3786 = vmatpush1.bf16.msra.mxu1 %v4397_v12  ;;  %2347 = vmatprep.mubr.f32.mxu1 %v4160_v36 }
0x154b   :  { %3788 = vmatprep.subr.bf16.mxu1 %v4408_v15 }
0x154e   :  { %3790 = vmatpush1.bf16.msra.mxu1 %v4416_v18 }
0x154f   :  { %3792 = vmatprep.subr.bf16.mxu1 %v4426_v21 }
0x1552   :  { %3794 = vmatpush1.bf16.msra.mxu1 %v4434_v24 }
0x1553   :  { %3796 = vmatprep.subr.bf16.mxu1 %v4444_v27 }
0x1556   :  { %3798 = vmatpush1.bf16.msra.mxu1 %v4452_v30 }
0x1557   :  { %3816 = vmatprep.subr.bf16.mxu1 %v4389_v9 }
0x161c   :  { %v2124_v60 = vpop.f32.mrb[24].mxu1 }
0x161d   :  { %v2126_v62 = vpop.f32.mrb[25].mxu1  ;;  %v2129_v4 = vadd.f32 %v2124_v60, %v4493_v59 }
0x161e   :  { %v2130_v0 = vadd.f32 %v2126_v62, %v4495_v61 }
0x161f   :  { %v3304_v5 = vmul.f32 -1.442695, %v2129_v4 }
0x1620   :  { %4040 = vtanh.f32 %v2130_v0  ;;  %v3305_v22 = vmul.f32 -1.442695, %v2130_v0 }
0x1621   :  { %4042 = vpow2.f32 %v3304_v5 }
0x162a   :  { %v4041_v3 = vpop.eup %4040 }
0x162b   :  { %2149 = vrot.lane.b32.xlu0 %v4041_v3, %s4161_s3  ;;  %v4043_v6 = vpop.eup %4042 }
0x162c   :  { %v2137_v8 = vadd.f32 1.0, %v4043_v6 }
0x162e   :  { %4044 = vrcp.f32 %v2137_v8 }
0x1638   :  { %v4045_v10 = vpop.eup %4044 }
0x1639   :  { %v2147_v16 = vmul.f32 %v4045_v10, %v2145_v14 }
0x169d   :  { %v2150_v11 = vpop.permute.xlu0 %2149 }
0x169e   :  { %v2152_v13 = vmul.f32 %v4045_v10, %v2150_v11 }
0x16a0   :  { %2154 = vrot.lane.b32.xlu1 %v2152_v13, %s4161_s3 }
0x1712   :  { %v2155_v17 = vpop.permute.xlu1 %2154 }
0x1713   :  { %v2157_v19 = vadd.f32 %v2155_v17, %v2147_v16 }
0x1715   :  { %4046 = vtanh.f32 %v2157_v19  ;;  %v2260_v45 = vrot.slane %v2157_v19, 6 }
0x1716   :  { %4048 = vpow2.f32 %v3305_v22 }
0x171f   :  { %v4047_v20 = vpop.eup %4046 }
0x1720   :  { %2160 = vrot.lane.b32.xlu0 %v4047_v20, %s4161_s3  ;;  %v4049_v23 = vpop.eup %4048 }
0x1721   :  { %v2138_v25 = vadd.f32 1.0, %v4049_v23 }
0x1723   :  { %4050 = vrcp.f32 %v2138_v25 }
0x172d   :  { %v4051_v26 = vpop.eup %4050 }
0x1792   :  { %v2161_v28 = vpop.permute.xlu0 %2160 }
0x1793   :  { %v2163_v29 = vmul.f32 %v4051_v26, %v2161_v28 }
0x1795   :  { %3306 = vmatmul.mubr.msk.f32.vlgmr.msra.gmra.mrb[16].mxu0 %vm1144_vm5, %v2163_v29 }
0x1796   :  { %3802 = vmatpush1.bf16.msra.mxu0 %v4397_v12  ;;  %2463 = vmatprep.mubr.f32.mxu0 %v4160_v36 }
0x1797   :  { %3804 = vmatprep.subr.bf16.mxu0 %v4408_v15 }
0x179a   :  { %3806 = vmatpush1.bf16.msra.mxu0 %v4416_v18 }
0x179b   :  { %3808 = vmatprep.subr.bf16.mxu0 %v4426_v21 }
0x179e   :  { %3810 = vmatpush1.bf16.msra.mxu0 %v4434_v24 }
0x179f   :  { %3812 = vmatprep.subr.bf16.mxu0 %v4444_v27 }
0x17a2   :  { %3814 = vmatpush1.bf16.msra.mxu0 %v4452_v30 }
0x17a3   :  { %3832 = vmatprep.subr.bf16.mxu0 %v4389_v9 }
0x1868   :  { %v2233_v31 = vpop.f32.mrb[16].mxu0 }
0x1869   :  { %v2235_v32 = vpop.f32.mrb[17].mxu0  ;;  %v2240_v37 = vrot.slane %v2233_v31, 6 }
0x186a   :  { %v2241_v33 = vrot.slane %v2235_v32, 6 }
0x186b   :  { %v2244_v38 = vadd.f32 %v2240_v37, %v4493_v59 }
0x186c   :  { %v2245_v34 = vadd.f32 %v2241_v33, %v4495_v61 }
0x186d   :  { %v3307_v39 = vmul.f32 -1.442695, %v2244_v38 }
0x186e   :  { %4052 = vtanh.f32 %v2245_v34  ;;  %v3308_v50 = vmul.f32 -1.442695, %v2245_v34 }
0x186f   :  { %4054 = vpow2.f32 %v3307_v39 }
0x1878   :  { %v4053_v35 = vpop.eup %4052 }
0x1879   :  { %2264 = vrot.lane.b32.xlu1 %v4053_v35, %s4161_s3  ;;  %v4055_v40 = vpop.eup %4054 }
0x187a   :  { %v2252_v41 = vadd.f32 1.0, %v4055_v40 }
0x187c   :  { %4056 = vrcp.f32 %v2252_v41 }
0x1886   :  { %v4057_v42 = vpop.eup %4056 }
0x1887   :  { %v2262_v46 = vmul.f32 %v4057_v42, %v2260_v45 }
0x18eb   :  { %v2265_v43 = vpop.permute.xlu1 %2264 }
0x18ec   :  { %v2267_v44 = vmul.f32 %v4057_v42, %v2265_v43 }
0x18ee   :  { %2269 = vrot.lane.b32.xlu0 %v2267_v44, %s4161_s3 }
0x1960   :  { %v2270_v47 = vpop.permute.xlu0 %2269 }
0x1961   :  { %v2272_v48 = vadd.f32 %v2270_v47, %v2262_v46 }
0x1963   :  { %4058 = vtanh.f32 %v2272_v48  ;;  %v2376_v11 = vrot.slane %v2272_v48, 6 }
0x1964   :  { %4060 = vpow2.f32 %v3308_v50 }
0x196d   :  { %v4059_v49 = vpop.eup %4058 }
0x196e   :  { %2275 = vrot.lane.b32.xlu1 %v4059_v49, %s4161_s3  ;;  %v4061_v57 = vpop.eup %4060 }
0x196f   :  { %v2253_v51 = vadd.f32 1.0, %v4061_v57 }
0x1971   :  { %4062 = vrcp.f32 %v2253_v51 }
0x197b   :  { %v4063_v2 = vpop.eup %4062 }
0x19e0   :  { %v2276_v52 = vpop.permute.xlu1 %2275 }
0x19e1   :  { %v2278_v55 = vmul.f32 %v4063_v2, %v2276_v52 }
0x19e3   :  { %v2280_v53 = vrot.slane %v2278_v55, 2 }
0x19e5   :  { %3309 = vmatmul.mubr.msk.f32.vlgmr.msra.gmra.mrb[26].mxu1 %vm1144_vm5, %v2280_v53 }
0x19e6   :  { %3818 = vmatpush1.bf16.msra.mxu1 %v4397_v12  ;;  %2579 = vmatprep.mubr.f32.mxu1 %v4160_v36 }
0x19e7   :  { %3820 = vmatprep.subr.bf16.mxu1 %v4408_v15 }
0x19ea   :  { %3822 = vmatpush1.bf16.msra.mxu1 %v4416_v18 }
0x19eb   :  { %3824 = vmatprep.subr.bf16.mxu1 %v4426_v21 }
0x19ee   :  { %3826 = vmatpush1.bf16.msra.mxu1 %v4434_v24 }
0x19ef   :  { %3828 = vmatprep.subr.bf16.mxu1 %v4444_v27 }
0x19f2   :  { %3830 = vmatpush1.bf16.msra.mxu1 %v4452_v30 }
0x19f3   :  { %3848 = vmatprep.subr.bf16.mxu1 %v4389_v9 }
0x1ab8   :  { %v2349_v54 = vpop.f32.mrb[26].mxu1 }
0x1ab9   :  { %v2351_v7 = vpop.f32.mrb[27].mxu1  ;;  %v2356_v62 = vrot.slane %v2349_v54, 4 }
0x1aba   :  { %v2357_v56 = vrot.slane %v2351_v7, 4 }
0x1abb   :  { %v2360_v0 = vadd.f32 %v2356_v62, %v4493_v59 }
0x1abc   :  { %v2361_v58 = vadd.f32 %v2357_v56, %v4495_v61 }
0x1abd   :  { %v3310_v3 = vmul.f32 -1.442695, %v2360_v0 }
0x1abe   :  { %4064 = vtanh.f32 %v2361_v58  ;;  %v3311_v19 = vmul.f32 -1.442695, %v2361_v58 }
0x1abf   :  { %4066 = vpow2.f32 %v3310_v3 }
0x1ac8   :  { %v4065_v60 = vpop.eup %4064 }
0x1ac9   :  { %2380 = vrot.lane.b32.xlu0 %v4065_v60, %s4161_s3  ;;  %v4067_v4 = vpop.eup %4066 }
0x1aca   :  { %v2368_v5 = vadd.f32 1.0, %v4067_v4 }
0x1acc   :  { %4068 = vrcp.f32 %v2368_v5 }
0x1ad6   :  { %v4069_v6 = vpop.eup %4068 }
0x1ad7   :  { %v2378_v13 = vmul.f32 %v4069_v6, %v2376_v11 }
0x1b3b   :  { %v2381_v8 = vpop.permute.xlu0 %2380 }
0x1b3c   :  { %v2383_v10 = vmul.f32 %v4069_v6, %v2381_v8 }
0x1b3e   :  { %2385 = vrot.lane.b32.xlu1 %v2383_v10, %s4161_s3 }
0x1bb0   :  { %v2386_v14 = vpop.permute.xlu1 %2385 }
0x1bb1   :  { %v2388_v16 = vadd.f32 %v2386_v14, %v2378_v13 }
0x1bb3   :  { %4070 = vtanh.f32 %v2388_v16  ;;  %v2492_v43 = vrot.slane %v2388_v16, 6 }
0x1bb4   :  { %4072 = vpow2.f32 %v3311_v19 }
0x1bbd   :  { %v4071_v17 = vpop.eup %4070 }
0x1bbe   :  { %2391 = vrot.lane.b32.xlu0 %v4071_v17, %s4161_s3  ;;  %v4073_v20 = vpop.eup %4072 }
0x1bbf   :  { %v2369_v22 = vadd.f32 1.0, %v4073_v20 }
0x1bc1   :  { %4074 = vrcp.f32 %v2369_v22 }
0x1bcb   :  { %v4075_v23 = vpop.eup %4074 }
0x1c30   :  { %v2392_v25 = vpop.permute.xlu0 %2391 }
0x1c31   :  { %v2394_v26 = vmul.f32 %v4075_v23, %v2392_v25 }
0x1c33   :  { %v2396_v28 = vrot.slane %v2394_v26, 4 }
0x1c35   :  { %3312 = vmatmul.mubr.msk.f32.vlgmr.msra.gmra.mrb[18].mxu0 %vm1144_vm5, %v2396_v28 }
0x1c36   :  { %3834 = vmatpush1.bf16.msra.mxu0 %v4397_v12  ;;  %2688 = vmatprep.mubr.f32.mxu0 %v4160_v36 }
0x1c37   :  { %3836 = vmatprep.subr.bf16.mxu0 %v4408_v15 }
0x1c3a   :  { %3838 = vmatpush1.bf16.msra.mxu0 %v4416_v18 }
0x1c3b   :  { %3840 = vmatprep.subr.bf16.mxu0 %v4426_v21 }
0x1c3e   :  { %3842 = vmatpush1.bf16.msra.mxu0 %v4434_v24 }
0x1c3f   :  { %3844 = vmatprep.subr.bf16.mxu0 %v4444_v27 }
0x1c42   :  { %3846 = vmatpush1.bf16.msra.mxu0 %v4452_v30 }
0x1c43   :  { %3864 = vmatprep.subr.bf16.mxu0 %v4389_v9 }
0x1d08   :  { %v2465_v29 = vpop.f32.mrb[18].mxu0 }
0x1d09   :  { %v2467_v31 = vpop.f32.mrb[19].mxu0  ;;  %v2472_v35 = vrot.slane %v2465_v29, 2 }
0x1d0a   :  { %v2473_v32 = vrot.slane %v2467_v31, 2 }
0x1d0b   :  { %v2476_v37 = vadd.f32 %v2472_v35, %v4493_v59 }
0x1d0c   :  { %v2477_v33 = vadd.f32 %v2473_v32, %v4495_v61 }
0x1d0d   :  { %v3313_v38 = vmul.f32 -1.442695, %v2476_v37 }
0x1d0e   :  { %4076 = vtanh.f32 %v2477_v33  ;;  %v3314_v47 = vmul.f32 -1.442695, %v2477_v33 }
0x1d0f   :  { %4078 = vpow2.f32 %v3313_v38 }
0x1d18   :  { %v4077_v34 = vpop.eup %4076 }
0x1d19   :  { %2496 = vrot.lane.b32.xlu1 %v4077_v34, %s4161_s3  ;;  %v4079_v39 = vpop.eup %4078 }
0x1d1a   :  { %v2484_v40 = vadd.f32 1.0, %v4079_v39 }
0x1d1c   :  { %4080 = vrcp.f32 %v2484_v40 }
0x1d26   :  { %v4081_v41 = vpop.eup %4080 }
0x1d27   :  { %v2494_v44 = vmul.f32 %v4081_v41, %v2492_v43 }
0x1d8b   :  { %v2497_v42 = vpop.permute.xlu1 %2496 }
0x1d8c   :  { %v2499_v9 = vmul.f32 %v4081_v41, %v2497_v42 }
0x1d8e   :  { %2501 = vrot.lane.b32.xlu0 %v2499_v9, %s4161_s3 }
0x1e00   :  { %v2502_v61 = vpop.permute.xlu0 %2501 }
0x1e01   :  { %v2504_v45 = vadd.f32 %v2502_v61, %v2494_v44 }
0x1e03   :  { %4082 = vtanh.f32 %v2504_v45  ;;  %v2602_v3 = vrot.slane %v2504_v45, 6 }
0x1e04   :  { %4084 = vpow2.f32 %v3314_v47 }
0x1e0d   :  { %v4083_v46 = vpop.eup %4082 }
0x1e0e   :  { %2507 = vrot.lane.b32.xlu1 %v4083_v46, %s4161_s3  ;;  %v4085_v59 = vpop.eup %4084 }
0x1e0f   :  { %v2485_v48 = vadd.f32 1.0, %v4085_v59 }
0x1e11   :  { %4086 = vrcp.f32 %v2485_v48 }
0x1e1b   :  { %v4087_v49 = vpop.eup %4086 }
0x1e80   :  { %v2508_v50 = vpop.permute.xlu1 %2507 }
0x1e81   :  { %v2510_v57 = vmul.f32 %v4087_v49, %v2508_v50 }
0x1e83   :  { %v2512_v51 = vrot.slane %v2510_v57, 6 }
0x1e85   :  { %3315 = vmatmul.mubr.msk.f32.vlgmr.msra.gmra.mrb[28].mxu1 %vm1144_vm5, %v2512_v51 }
0x1e86   :  { %3850 = vmatpush1.bf16.msra.mxu1 %v4397_v12  ;;  %2804 = vmatprep.mubr.f32.mxu1 %v4160_v36 }
0x1e87   :  { %3852 = vmatprep.subr.bf16.mxu1 %v4408_v15 }
0x1e8a   :  { %3854 = vmatpush1.bf16.msra.mxu1 %v4416_v18 }
0x1e8b   :  { %3856 = vmatprep.subr.bf16.mxu1 %v4426_v21 }
0x1e8e   :  { %3858 = vmatpush1.bf16.msra.mxu1 %v4434_v24 }
0x1e8f   :  { %3860 = vmatprep.subr.bf16.mxu1 %v4444_v27 }
0x1e92   :  { %3862 = vmatpush1.bf16.msra.mxu1 %v4452_v30 }
0x1e93   :  { %3524 = vmatprep.subr.mxu1 %v4160_v36 }
0x1f58   :  { %v2581_v2 = vpop.f32.mrb[28].mxu1 }
0x1f59   :  { %v2583_v52 = vpop.f32.mrb[29].mxu1  ;;  %v2586_v54 = vadd.f32 %v2581_v2, %v4497_v63 }
0x1f5a   :  { %v2587_v55 = vadd.f32 %v2583_v52, %v4499_v1 }
0x1f5b   :  { %v3316_v7 = vmul.f32 -1.442695, %v2586_v54 }
0x1f5c   :  { %4088 = vtanh.f32 %v2587_v55  ;;  %v3317_v10 = vmul.f32 -1.442695, %v2587_v55 }
0x1f5d   :  { %4090 = vpow2.f32 %v3316_v7 }
0x1f66   :  { %v4089_v53 = vpop.eup %4088 }
0x1f67   :  { %2606 = vrot.lane.b32.xlu0 %v4089_v53, %s4161_s3  ;;  %v4091_v56 = vpop.eup %4090 }
0x1f68   :  { %v2594_v58 = vadd.f32 1.0, %v4091_v56 }
0x1f6a   :  { %4092 = vrcp.f32 %v2594_v58 }
0x1f74   :  { %v4093_v60 = vpop.eup %4092 }
0x1f75   :  { %v2604_v4 = vmul.f32 %v4093_v60, %v2602_v3 }
0x1fd9   :  { %v2607_v62 = vpop.permute.xlu0 %2606 }
0x1fda   :  { %v2609_v0 = vmul.f32 %v4093_v60, %v2607_v62 }
0x1fdc   :  { %2611 = vrot.lane.b32.xlu1 %v2609_v0, %s4161_s3 }
0x204e   :  { %v2612_v5 = vpop.permute.xlu1 %2611 }
0x204f   :  { %v2614_v6 = vadd.f32 %v2612_v5, %v2604_v4 }
0x2051   :  { %4094 = vtanh.f32 %v2614_v6  ;;  %v2717_v28 = vrot.slane %v2614_v6, 6 }
0x2052   :  { %4096 = vpow2.f32 %v3317_v10 }
0x205b   :  { %v4095_v8 = vpop.eup %4094 }
0x205c   :  { %2617 = vrot.lane.b32.xlu0 %v4095_v8, %s4161_s3  ;;  %v4097_v11 = vpop.eup %4096 }
0x205d   :  { %v2595_v13 = vadd.f32 1.0, %v4097_v11 }
0x205f   :  { %4098 = vrcp.f32 %v2595_v13 }
0x2069   :  { %v4099_v14 = vpop.eup %4098 }
0x20ce   :  { %v2618_v16 = vpop.permute.xlu0 %2617 }
0x20cf   :  { %v2620_v17 = vmul.f32 %v4099_v14, %v2618_v16 }
0x20d1   :  { %3318 = vmatmul.mubr.msk.f32.vlgmr.msra.gmra.mrb[20].mxu0 %vm1144_vm5, %v2620_v17 }
0x20d2   :  { %3866 = vmatpush1.bf16.msra.mxu0 %v4397_v12  ;;  %2920 = vmatprep.mubr.f32.mxu0 %v4160_v36 }
0x20d3   :  { %3868 = vmatprep.subr.bf16.mxu0 %v4408_v15 }
0x20d6   :  { %3870 = vmatpush1.bf16.msra.mxu0 %v4416_v18 }
0x20d7   :  { %3872 = vmatprep.subr.bf16.mxu0 %v4426_v21 }
0x20da   :  { %3874 = vmatpush1.bf16.msra.mxu0 %v4434_v24 }
0x20db   :  { %3876 = vmatprep.subr.bf16.mxu0 %v4444_v27 }
0x20de   :  { %3878 = vmatpush1.bf16.msra.mxu0 %v4452_v30 }
0x21a4   :  { %v2690_v19 = vpop.f32.mrb[20].mxu0 }
0x21a5   :  { %v2692_v20 = vpop.f32.mrb[21].mxu0  ;;  %v2697_v15 = vrot.slane %v2690_v19, 6 }
0x21a6   :  { %v2698_v22 = vrot.slane %v2692_v20, 6 }
0x21a7   :  { %v2701_v18 = vadd.f32 %v2697_v15, %v4497_v63  ;;  %v4163_v15 = vmov 0.0|0.0  }
0x21a8   :  { %v2702_v23 = vadd.f32 %v2698_v22, %v4499_v1  ;;  %v2978_v22 = vld [vmem:[%s4795_s1] sm:$0x3]  ;;  %3891 = vmatprep.subr.bf16.mxu0 %v4163_v15 }
0x21a9   :  { %v3319_v25 = vmul.f32 -1.442695, %v2701_v18 }
0x21aa   :  { %4100 = vtanh.f32 %v2702_v23  ;;  %v3320_v34 = vmul.f32 -1.442695, %v2702_v23  ;;  %v2969_v23 = vld [vmem:[%s4798_s4 + $0x8] sm:$0xff] }
0x21ab   :  { %4102 = vpow2.f32 %v3319_v25  ;;  %v2971_v25 = vld [vmem:[%s4798_s4 + $0x18] sm:$0xff] }
0x21b4   :  { %v4101_v12 = vpop.eup %4100 }
0x21b5   :  { %2721 = vrot.lane.b32.xlu1 %v4101_v12, %s4161_s3  ;;  %v4103_v21 = vpop.eup %4102  ;;  %v2970_v12 = vld [vmem:[%s4798_s4 + $0x10] sm:$0xff] }
0x21b6   :  { %v2709_v24 = vadd.f32 1.0, %v4103_v21  ;;  %v3883_v21 = vpack.c.bf16 %v2971_v25, %v2970_v12 }
0x21b8   :  { %4104 = vrcp.f32 %v2709_v24  ;;  %v2972_v24 = vld [vmem:[%s4798_s4 + $0x20] sm:$0xff] }
0x21c2   :  { %v4105_v27 = vpop.eup %4104 }
0x21c3   :  { %v2719_v29 = vmul.f32 %v4105_v27, %v2717_v28 }
0x2227   :  { %v2722_v26 = vpop.permute.xlu1 %2721 }
0x2228   :  { %v2724_v30 = vmul.f32 %v4105_v27, %v2722_v26  ;;  %v2973_v27 = vld [vmem:[%s4798_s4 + $0x28] sm:$0xff] }
0x2229   :  { %v3886_v26 = vpack.c.bf16 %v2973_v27, %v2972_v24 }
0x222a   :  { %2726 = vrot.lane.b32.xlu0 %v2724_v30, %s4161_s3 }
0x229c   :  { %v2727_v31 = vpop.permute.xlu0 %2726 }
0x229d   :  { %v2729_v32 = vadd.f32 %v2727_v31, %v2719_v29  ;;  %v2975_v29 = vld [vmem:[%s4798_s4 + $0x38] sm:$0xff] }
0x229f   :  { %4106 = vtanh.f32 %v2729_v32  ;;  %v2833_v51 = vrot.slane %v2729_v32, 6 }
0x22a0   :  { %4108 = vpow2.f32 %v3320_v34  ;;  %v3136_v34 = vld [vmem:[%s4799_s5] sm:$0xff] }
0x22a9   :  { %v4107_v33 = vpop.eup %4106 }
0x22aa   :  { %2732 = vrot.lane.b32.xlu1 %v4107_v33, %s4161_s3  ;;  %v4109_v35 = vpop.eup %4108 }
0x22ab   :  { %v2710_v37 = vadd.f32 1.0, %v4109_v35  ;;  %v3137_v35 = vld [vmem:[%s4799_s5 + $0x8] sm:$0xff] }
0x22ad   :  { %4110 = vrcp.f32 %v2710_v37  ;;  %v3138_v37 = vld [vmem:[%s4799_s5 + $0x10] sm:$0xff] }
0x22b7   :  { %v4111_v38 = vpop.eup %4110 }
0x231c   :  { %v2733_v39 = vpop.permute.xlu1 %2732 }
0x231d   :  { %v2735_v40 = vmul.f32 %v4111_v38, %v2733_v39  ;;  %v3892_v38 = vpack.c.bf16 %v3137_v35, %v3136_v34  ;;  %v3139_v39 = vld [vmem:[%s4799_s5 + $0x18] sm:$0xff] }
0x231f   :  { %v2737_v41 = vrot.slane %v2735_v40, 2  ;;  %v3895_v40 = vpack.c.bf16 %v3139_v39, %v3138_v37 }
0x2321   :  { %3321 = vmatmul.mubr.msk.f32.vlgmr.msra.gmra.mrb[30].mxu1 %vm1144_vm5, %v2737_v41 }
0x2322   :  { %3526 = vmatprep.mubr.msk.f32.mxu1 %vm4162_vm7, %v4160_v36 }
0x23f4   :  { %v2806_v42 = vpop.f32.mrb[30].mxu1 }
0x23f5   :  { %v2808_v9 = vpop.f32.mrb[31].mxu1  ;;  %v2813_v45 = vrot.slane %v2806_v42, 4 }
0x23f6   :  { %v2814_v43 = vrot.slane %v2808_v9, 4 }
0x23f7   :  { %v2817_v46 = vadd.f32 %v2813_v45, %v4497_v63 }
0x23f8   :  { %v2818_v44 = vadd.f32 %v2814_v43, %v4499_v1 }
0x23f9   :  { %v3322_v47 = vmul.f32 -1.442695, %v2817_v46 }
0x23fa   :  { %4112 = vtanh.f32 %v2818_v44  ;;  %v3323_v54 = vmul.f32 -1.442695, %v2818_v44 }
0x23fb   :  { %4114 = vpow2.f32 %v3322_v47 }
0x2404   :  { %v4113_v61 = vpop.eup %4112 }
0x2405   :  { %2837 = vrot.lane.b32.xlu0 %v4113_v61, %s4161_s3  ;;  %v4115_v59 = vpop.eup %4114 }
0x2406   :  { %v2825_v48 = vadd.f32 1.0, %v4115_v59 }
0x2408   :  { %4116 = vrcp.f32 %v2825_v48  ;;  %v3140_v48 = vld [vmem:[%s4799_s5 + $0x20] sm:$0xff] }
0x2412   :  { %v4117_v49 = vpop.eup %4116 }
0x2413   :  { %v2835_v2 = vmul.f32 %v4117_v49, %v2833_v51  ;;  %v3143_v51 = vld [vmem:[%s4799_s5 + $0x38] sm:$0xff] }
0x2477   :  { %v2838_v50 = vpop.permute.xlu0 %2837 }
0x2478   :  { %v2840_v57 = vmul.f32 %v4117_v49, %v2838_v50  ;;  %v3141_v49 = vld [vmem:[%s4799_s5 + $0x28] sm:$0xff] }
0x2479   :  { %v3898_v50 = vpack.c.bf16 %v3141_v49, %v3140_v48 }
0x247a   :  { %2842 = vrot.lane.b32.xlu1 %v2840_v57, %s4161_s3  ;;  %v3142_v57 = vld [vmem:[%s4799_s5 + $0x30] sm:$0xff] }
0x24ec   :  { %v2843_v52 = vpop.permute.xlu1 %2842 }
0x24ed   :  { %v2845_v55 = vadd.f32 %v2843_v52, %v2835_v2  ;;  %v3901_v2 = vpack.c.bf16 %v3143_v51, %v3142_v57  ;;  %v3330_v52 = vld [vmem:[%s4798_s4 + $0x48] ss:$0 sm:$0xff] }
0x24ef   :  { %4118 = vtanh.f32 %v2845_v55  ;;  %v2949_v30 = vrot.slane %v2845_v55, 6 }
0x24f0   :  { %4120 = vpow2.f32 %v3323_v54 }
0x24f9   :  { %v4119_v53 = vpop.eup %4118 }
0x24fa   :  { %2848 = vrot.lane.b32.xlu0 %v4119_v53, %s4161_s3  ;;  %v4121_v7 = vpop.eup %4120 }
0x24fb   :  { %v2826_v56 = vadd.f32 1.0, %v4121_v7 }
0x24fd   :  { %4122 = vrcp.f32 %v2826_v56 }
0x2507   :  { %v4123_v58 = vpop.eup %4122 }
0x256c   :  { %v2849_v60 = vpop.permute.xlu0 %2848 }
0x256d   :  { %v2851_v62 = vmul.f32 %v4123_v58, %v2849_v60  ;;  %v3331_v58 = vld [vmem:[%s4799_s5 + $0x40] ss:$0 sm:$0xff] }
0x256f   :  { %v2853_v0 = vrot.slane %v2851_v62, 4 }
0x2571   :  { %3324 = vmatmul.mubr.msk.f32.vlgmr.msra.gmra.mrb[22].mxu0 %vm1144_vm5, %v2853_v0 }
0x2572   :  { %3564 = vmatprep.mubr.msk.f32.mxu0 %vm4162_vm7, %v4160_v36  ;;  %3893 = vmatpush3.bf16.msra.mxu0 %v3892_v38 }
0x2573   :  { %3894 = vmatprep.subr.bf16.mxu0 %v4163_v15 }
0x2576   :  { %3896 = vmatpush3.bf16.msra.mxu0 %v3895_v40 }
0x2577   :  { %3897 = vmatprep.subr.bf16.mxu0 %v4163_v15 }
0x257a   :  { %3899 = vmatpush3.bf16.msra.mxu0 %v3898_v50 }
0x257b   :  { %3900 = vmatprep.subr.bf16.mxu0 %v4163_v15 }
0x257e   :  { %3902 = vmatpush3.bf16.msra.mxu0 %v3901_v2 }
0x2644   :  { %v2922_v3 = vpop.f32.mrb[22].mxu0 }
0x2645   :  { %v2924_v4 = vpop.f32.mrb[23].mxu0  ;;  %v2929_v10 = vrot.slane %v2922_v3, 2 }
0x2646   :  { %v2930_v5 = vrot.slane %v2924_v4, 2 }
0x2647   :  { %v2933_v11 = vadd.f32 %v2929_v10, %v4497_v63  ;;  %v2968_v63 = vld [vmem:[%s4798_s4] sm:$0xff] }
0x2648   :  { %v2934_v6 = vadd.f32 %v2930_v5, %v4499_v1  ;;  %v2976_v1 = vld [vmem:[%s4798_s4 + $0x40] sm:$0xf]  ;;  %v3880_v18 = vpack.c.bf16 %v2969_v23, %v2968_v63 }
0x2649   :  { %v3325_v13 = vmul.f32 -1.442695, %v2933_v11  ;;  %3525 = vmatpush3.msk.msra.mxu1 %vm259_vm3, %v2976_v1 }
0x264a   :  { %4124 = vtanh.f32 %v2934_v6  ;;  %3527 = vmatmul.mubr.msk.f32.vlgmr.msra.gmra.mrb[32].mxu1 %vm2979_vm6, %v2978_v22  ;;  %3879 = vmatprep.subr.bf16.mxu1 %v4163_v15  ;;  %v3326_v42 = vmul.f32 -1.442695, %v2934_v6 }
0x264b   :  { %4126 = vpow2.f32 %v3325_v13  ;;  %3545 = vmatprep.mubr.msk.f32.mxu1 %vm4162_vm7, %v4160_v36  ;;  %3881 = vmatpush3.bf16.msra.mxu1 %v3880_v18  ;;  %v2974_v36 = vld [vmem:[%s4798_s4 + $0x30] sm:$0xff]  ;;  %s4136_s4 = scalar_lea.vmem %s3231_s25, 32 }
0x264c   :  { %3882 = vmatprep.subr.bf16.mxu1 %v4163_v15  ;;  %v3889_v32 = vpack.c.bf16 %v2975_v29, %v2974_v36  ;;  %p4137_p0 = scmp.ne.s32.totalorder %s3231_s25, %s4136_s4  ;;  %p4142_p2 = scmp.lt.s32.totalorder %s4136_s4, %s4136_s4 }
0x264e   :  { %p4143_p3 = por %p4142_p2, %p4141_p1 }
0x264f   :  { %3884 = vmatpush3.bf16.msra.mxu1 %v3883_v21 }
0x2650   :  { %3885 = vmatprep.subr.bf16.mxu1 %v4163_v15  ;;  %p4144_p4 = pnand %p4143_p3, %p4137_p0 }
0x2653   :  { %3887 = vmatpush3.bf16.msra.mxu1 %v3886_v26 }
0x2654   :  { %v4125_v8 = vpop.eup %4124  ;;  %3888 = vmatprep.subr.bf16.mxu1 %v4163_v15 }
0x2655   :  { %2953 = vrot.lane.b32.xlu1 %v4125_v8, %s4161_s3  ;;  %v4127_v14 = vpop.eup %4126 }
0x2656   :  { %v2941_v16 = vadd.f32 1.0, %v4127_v14 }
0x2657   :  { %3890 = vmatpush3.bf16.msra.mxu1 %v3889_v32 }
0x2658   :  { %4128 = vrcp.f32 %v2941_v16 }
0x2662   :  { %v4129_v17 = vpop.eup %4128 }
0x2663   :  { %v2951_v28 = vmul.f32 %v4129_v17, %v2949_v30 }
0x26c7   :  { %v2954_v19 = vpop.permute.xlu1 %2953 }
0x26c8   :  { %v2956_v20 = vmul.f32 %v4129_v17, %v2954_v19 }
0x26ca   :  { %2958 = vrot.lane.b32.xlu0 %v2956_v20, %s4161_s3 }
0x271d   :  { %v3052_v9 = vpop.f32.mrb[32].mxu1 }
0x271e   :  { %v3528_v43 = vpop.f32.mrb[33].mxu1 }
0x273c   :  { %v2959_v31 = vpop.permute.xlu0 %2958 }
0x273d   :  { %v2961_v33 = vadd.f32 %v2959_v31, %v2951_v28 }
0x273f   :  { %4130 = vtanh.f32 %v2961_v33 }
0x2740   :  { %4132 = vpow2.f32 %v3326_v42 }
0x2749   :  { %v4131_v41 = vpop.eup %4130 }
0x274a   :  { %2964 = vrot.lane.b32.xlu1 %v4131_v41, %s4161_s3  ;;  %v4133_v44 = vpop.eup %4132 }
0x274b   :  { %v2942_v61 = vadd.f32 1.0, %v4133_v44 }
0x274d   :  { %4134 = vrcp.f32 %v2942_v61 }
0x2757   :  { %v4135_v45 = vpop.eup %4134 }
0x27bc   :  { %v2965_v46 = vpop.permute.xlu1 %2964 }
0x27bd   :  { %v2967_v47 = vmul.f32 %v4135_v45, %v2965_v46 }
0x27bf   :  { %v3057_v59 = vrot.slane %v2967_v47, 6 }
0x27c1   :  { %3546 = vmatmul.mubr.msk.f32.vlgmr.msra.gmra.mrb[34].mxu1 %vm1144_vm5, %v3057_v59 }
0x2894   :  { %v3126_v55 = vpop.f32.mrb[34].mxu1 }
0x2895   :  { %v3127_v53 = vadd.f32 %v3126_v55, %v3052_v9  ;;  %v3547_v54 = vpop.f32.mrb[35].mxu1 }
0x2897   :  { %v3134_v7 = vadd.f32 %v3330_v52, %v3127_v53 }
0x2899   :  { %v3135_v56 = vmax.f32 %v3134_v7, 0.0 }
0x289b   :  { %3565 = vmatmul.mubr.msk.f32.vlgmr.msra.gmra.mrb[24].mxu0 %vm1144_vm5, %v3135_v56 }
0x296e   :  { %v3218_v60 = vpop.f32.mrb[24].mxu0 }
0x296f   :  { %v3219_v62 = vadd.f32 %v3331_v58, %v3218_v60  ;;  %v3566_v0 = vpop.f32.mrb[25].mxu0 }
0x2971   :  { %3223 = vst.msk [vmem:[#allocation2] sm:$0x3] %vm3222_vm8, %v3219_v62 }
0x2972   :  { %4147 = shalt.err (!%p4144_p4)
}
0x2973   :  { %s4148_s28 = scalar_lea.hbm %s4800_s6, 32 }
0x2974   :  { %p4149_p5 = scmp.ne.s32.totalorder %s4800_s6, %s4148_s28  ;;  %p4152_p6 = scmp.lt.u32.totalorder %s4148_s28, %s4800_s6 }
0x2976   :  { %p4154_p7 = pnand %p4152_p6, %p4149_p5 }
0x2978   :  { %4157 = shalt.err (!%p4154_p7)
}
0x2979   :  { %3233 = dma.vmem_to_hbm [thread:$0]  %s3231_s25, 32, %s4800_s6, [#allocation3]  }
0x297a   :  { %4158 = dma.done.wait [#allocation3], 32  }
0x297b   :  { %4159 = vsyncadd [#allocation3], 4294967264 }
0x297c   :  { %3237 = vsyncpa [#allocation3], 1 }

</bundles_post_ra>
